<compile_context>
chip_gen: v7x
topology: tpu7x:2x2x1
jax: 0.10.0
libtpu: 0.0.40
codegen_flags: <defaults>
</compile_context>

<pallas_src>
from functools import lru_cache

import numpy as np

import jax
import jax.numpy as jnp
from jax.experimental import pallas as pl
from jax.experimental.pallas import tpu as pltpu

K = 7            # pool kernel size
PAD = K // 2     # reflection pad
HALO = 8         # halo rows fetched above/below each H tile (>= PAD, multiple of 8)
C1 = 0.01 ** 2
C2 = 0.03 ** 2


def _reflect(i, L):
    if i < 0:
        return -i
    if i >= L:
        return 2 * (L - 1) - i
    return i


# ----------------------------------------------------------------------------
# band matrices (reflection padding + 7-tap box filter folded into 0/1/2 ints)
# ----------------------------------------------------------------------------
@lru_cache(maxsize=32)
def _h_band(H, TH):
    """(nH, TH, THL) f32 row band; reflection + halo layout + 1/49 folded in."""
    nH = H // TH
    if nH == 1:
        THL = TH
        bh = np.zeros((1, TH, THL), np.float32)
        for i in range(TH):
            for d in range(-PAD, PAD + 1):
                bh[0, i, _reflect(i + d, H)] += 1.0
    else:
        THL = TH + 2 * HALO
        th8 = TH // 8
        nb8 = H // 8
        bh = np.zeros((nH, TH, THL), np.float32)
        for h in range(nH):
            r0 = h * TH
            prev_start = max(h * th8 - 1, 0) * 8
            next_start = min((h + 1) * th8, nb8 - 1) * 8
            for i in range(TH):
                for d in range(-PAD, PAD + 1):
                    g = _reflect(r0 + i + d, H)
                    if r0 <= g < r0 + TH:
                        c = HALO + (g - r0)                       # current tile rows
                    elif h > 0 and prev_start <= g < prev_start + HALO:
                        c = g - prev_start                        # prev halo rows
                    elif h < nH - 1 and next_start <= g < next_start + HALO:
                        c = TH + HALO + (g - next_start)          # next halo rows
                    else:
                        raise AssertionError("SSIM: H band row not covered")
                    bh[h, i, c] += 1.0
    return bh * np.float32(1.0 / (K * K))


@lru_cache(maxsize=32)
def _w_band(W, Wp, TW, TWH, slab_starts):
    """(nW, TWH, TW) f32 block-banded column filter (reflection w.r.t. W)."""
    nW = Wp // TW
    bw = np.zeros((nW, TWH, TW), np.float32)
    for w in range(nW):
        s = slab_starts[w]
        for vl in range(TW):
            v = w * TW + vl
            if v >= W:                     # padded output column stays zero
                continue
            for d in range(-PAD, PAD + 1):
                g = _reflect(v + d, W)
                r = g - s
                assert 0 <= r < TWH, "SSIM: W band column not covered"
                bw[w, r, vl] += 1.0
    return bw


def _choose_w_tiling(Wp):
    """Block-banded W pass: TW output columns per tile, 128-col halos each side."""
    if Wp > 512:
        TW = 256 if Wp % 256 == 0 else 128
        TWH = TW + 2 * 128
        nW = Wp // TW
        starts = tuple(min(max(w * TW - 128, 0), Wp - TWH) for w in range(nW))
    else:
        TW = TWH = Wp
        nW = 1
        starts = (0,)
    return TW, TWH, nW, starts


# ----------------------------------------------------------------------------
# VMEM budgeting / tile selection (generation-aware)
# ----------------------------------------------------------------------------
def _vmem_capacity_bytes():
    try:
        return int(pltpu.get_tpu_info().vmem_capacity_bytes)
    except Exception:
        return 64 * 1024 * 1024            # conservative default (v7x per-TC)


def _vmem_estimate(TN, TH, THL, Wp, band_elems, esize):
    blocks = 2 * esize * TN * Wp * (3 * TH + 4 * HALO)   # x/y/out (+halos), dbl-buffered
    bands = 2 * 4 * (TH * THL + band_elems)              # bh tile + bw blocks, dbl-buffered
    temps = 4 * TN * Wp * (7 * THL + 18 * TH)            # in-kernel f32 temporaries
    return blocks + bands + temps


def _choose_tiles(N, H, Wp, esize, budget, band_elems, max_tile_h, max_tile_n):
    cands = sorted({d for d in range(8, min(H, max_tile_h) + 1, 8) if H % d == 0})
    if H <= max_tile_h or not cands:
        cands.append(H)                    # full-height tile (no halos)
    cands = sorted(set(cands))

    def thl(th):
        return th if th == H else th + 2 * HALO

    def est(tn, th):
        return _vmem_estimate(tn, th, thl(th), Wp, band_elems, esize)

    fitting = [th for th in cands if est(1, th) <= budget]
    TH = max(fitting) if fitting else min(cands)
    nH = H // TH
    TN = 1
    for tn in range(2, min(N, max_tile_n) + 1):
        if N % tn:
            continue
        if est(tn, TH) > budget:
            break
        if (N // tn) * nH < 2 and N * nH >= 2:
            continue                       # keep >= 2 grid steps for the 2 TCs on v7x
        TN = tn
    return TN, TH


# ----------------------------------------------------------------------------
# kernel (generated per static configuration)
# ----------------------------------------------------------------------------
def _make_kernel(TN, TH, THL, Wp, nW, TWH, slab_starts, has_halo):
    nq = 5 * TN
    P = TN * TH

    def kernel(*refs):
        if has_halo:
            (bh_ref, bw_ref, xp_ref, xc_ref, xn_ref,
             yp_ref, yc_ref, yn_ref, o_ref) = refs
        else:
            bh_ref, bw_ref, xc_ref, yc_ref, o_ref = refs

        bh = bh_ref[0]                     # (TH, THL), includes the 1/49 scale

        xs, ys = [], []
        for n in range(TN):
            if has_halo:
                xi = jnp.concatenate([xp_ref[n], xc_ref[n], xn_ref[n]], axis=0)
                yi = jnp.concatenate([yp_ref[n], yc_ref[n], yn_ref[n]], axis=0)
            else:
                xi = xc_ref[n]
                yi = yc_ref[n]
            xs.append(xi.astype(jnp.float32))
            ys.append(yi.astype(jnp.float32))

        # quantity-major lane stack: [x_* | y_* | xx_* | yy_* | xy_*], each Wp wide
        cols = (xs + ys
                + [xi * xi for xi in xs]
                + [yi * yi for yi in ys]
                + [xi * yi for xi, yi in zip(xs, ys)])
        stacked = jnp.concatenate(cols, axis=1)                       # (THL, 5*TN*Wp)

        # H pass: one MXU matmul for all images & quantities (halo rows dropped here)
        hf = jnp.dot(bh, stacked, preferred_element_type=jnp.float32)  # (TH, 5*TN*Wp)

        # restack lane chunks onto sublanes for the W pass: (5*TN*TH, Wp)
        g = jnp.concatenate([hf[:, i * Wp:(i + 1) * Wp] for i in range(nq)], axis=0)

        # W pass: block-banded matmul(s)
        if nW == 1:
            f = jnp.dot(g, bw_ref[0], preferred_element_type=jnp.float32)
        else:
            parts = []
            for w in range(nW):
                s = slab_starts[w]
                parts.append(jnp.dot(g[:, s:s + TWH], bw_ref[w],
                                     preferred_element_type=jnp.float32))
            f = jnp.concatenate(parts, axis=1)                        # (5*TN*TH, Wp)

        mu_x = f[0 * P:1 * P]
        mu_y = f[1 * P:2 * P]
        mu_xx = f[2 * P:3 * P]
        mu_yy = f[3 * P:4 * P]
        mu_xy = f[4 * P:5 * P]

        sigma_x = mu_xx - mu_x * mu_x
        sigma_y = mu_yy - mu_y * mu_y
        sigma_xy = mu_xy - mu_x * mu_y

        ssim_n = (2.0 * mu_x * mu_y + C1) * (2.0 * sigma_xy + C2)
        ssim_d = (mu_x * mu_x + mu_y * mu_y + C1) * (sigma_x + sigma_y + C2)
        out = jnp.clip((1.0 - ssim_n * pl.reciprocal(ssim_d, approx=False)) * 0.5,
                       0.0, 1.0)
        o_ref[...] = out.reshape(TN, TH, Wp).astype(o_ref.dtype)

    return kernel


# ----------------------------------------------------------------------------
# wrapper
# ----------------------------------------------------------------------------
def ssim_pallas(x, y, *, max_tile_h=256, max_tile_n=8):
    """SSIM loss map; x, y are NCHW float arrays, output has the same shape."""
    assert x.shape == y.shape and x.ndim == 4
    B, C, H, W = x.shape
    assert H >= PAD + 1 and W >= PAD + 1, "ReflectionPad2d(3) needs H, W >= 4"
    N = B * C
    esize = jnp.dtype(x.dtype).itemsize

    # lane-dense width (pad to a multiple of 128; band cols for the pad are zero)
    Wp = W if W % 128 == 0 else ((W // 128) + 1) * 128
    TW, TWH, nW, slab_starts = _choose_w_tiling(Wp)
    band_elems = nW * TWH * TW

    cap = _vmem_capacity_bytes()
    budget = max(24 << 20, min(int(cap * 0.40), 96 << 20))

    TN, TH = _choose_tiles(N, H, Wp, esize, budget, band_elems, max_tile_h, max_tile_n)
    nH = H // TH
    has_halo = nH > 1
    THL = TH + 2 * HALO if has_halo else TH

    bh = jnp.asarray(_h_band(H, TH))                         # (nH, TH, THL)
    bw = jnp.asarray(_w_band(W, Wp, TW, TWH, slab_starts))   # (nW, TWH, TW)

    x3 = x.reshape(N, H, W)
    y3 = y.reshape(N, H, W)
    if Wp != W:
        pad = ((0, 0), (0, 0), (0, Wp - W))
        x3 = jnp.pad(x3, pad)
        y3 = jnp.pad(y3, pad)

    def cur_map(n, h):
        return (n, h, 0)

    in_specs = [
        pl.BlockSpec((1, TH, THL), lambda n, h: (h, 0, 0)),   # per-H-tile row band
        pl.BlockSpec((nW, TWH, TW), lambda n, h: (0, 0, 0)),  # block-banded col band
    ]
    inputs = [bh, bw]
    if has_halo:
        th8 = TH // 8
        nb8 = H // 8

        def prev_map(n, h):
            return (n, jnp.maximum(h * th8 - 1, 0), 0)

        def next_map(n, h):
            return (n, jnp.minimum((h + 1) * th8, nb8 - 1), 0)

        in_specs += [
            pl.BlockSpec((TN, HALO, Wp), prev_map),           # x: halo above
            pl.BlockSpec((TN, TH, Wp), cur_map),              # x: current rows
            pl.BlockSpec((TN, HALO, Wp), next_map),           # x: halo below
            pl.BlockSpec((TN, HALO, Wp), prev_map),           # y: halo above
            pl.BlockSpec((TN, TH, Wp), cur_map),              # y: current rows
            pl.BlockSpec((TN, HALO, Wp), next_map),           # y: halo below
        ]
        inputs += [x3, x3, x3, y3, y3, y3]
    else:
        in_specs += [
            pl.BlockSpec((TN, TH, Wp), cur_map),              # x
            pl.BlockSpec((TN, TH, Wp), cur_map),              # y
        ]
        inputs += [x3, y3]

    est = _vmem_estimate(TN, TH, THL, Wp, band_elems, esize)
    vmem_limit = int(min(max(int(est * 1.5), 32 << 20), int(cap * 0.78)))
    vmem_limit = max(vmem_limit, 16 << 20)

    kernel = _make_kernel(TN, TH, THL, Wp, nW, TWH, slab_starts, has_halo)

    out3 = pl.pallas_call(
        kernel,
        out_shape=jax.ShapeDtypeStruct((N, H, Wp), x.dtype),
        grid_spec=pltpu.PrefetchScalarGridSpec(
            num_scalar_prefetch=0,
            grid=(N // TN, nH),
            in_specs=in_specs,
            out_specs=pl.BlockSpec((TN, TH, Wp), cur_map),
        ),
        compiler_params=pltpu.CompilerParams(
            dimension_semantics=("parallel", "parallel"),
            vmem_limit_bytes=vmem_limit,
        ),
    )(*inputs)

    if Wp != W:
        out3 = out3[:, :, :W]
    return out3.reshape(B, C, H, W)


# ----------------------------------------------------------------------------
# pure-JAX reference (mirrors the PyTorch module)
# ----------------------------------------------------------------------------
def ssim_reference(x, y):
    xp = jnp.pad(x, ((0, 0), (0, 0), (PAD, PAD), (PAD, PAD)), mode="reflect")
    yp = jnp.pad(y, ((0, 0), (0, 0), (PAD, PAD), (PAD, PAD)), mode="reflect")

    def avg_pool(a):
        return jax.lax.reduce_window(
            a, 0.0, jax.lax.add,
            window_dimensions=(1, 1, K, K),
            window_strides=(1, 1, 1, 1),
            padding="VALID",
        ) / (K * K)

    mu_x = avg_pool(xp)
    mu_y = avg_pool(yp)
    sigma_x = avg_pool(xp * xp) - mu_x ** 2
    sigma_y = avg_pool(yp * yp) - mu_y ** 2
    sigma_xy = avg_pool(xp * yp) - mu_x * mu_y
    n = (2 * mu_x * mu_y + C1) * (2 * sigma_xy + C2)
    d = (mu_x ** 2 + mu_y ** 2 + C1) * (sigma_x + sigma_y + C2)
    return jnp.clip((1 - n / d) / 2, 0.0, 1.0)


if __name__ == "__main__":
    key = jax.random.PRNGKey(0)
    kx, ky = jax.random.split(key)

    # case 1: small NCHW, single H tile (no halos), padded lane dimension
    B, C, H, W = 2, 4, 16, 16
    x = jax.random.uniform(kx, (B, C, H, W), dtype=jnp.float32)
    y = jax.random.uniform(ky, (B, C, H, W), dtype=jnp.float32)
    out = ssim_pallas(x, y)
    jax.block_until_ready(out)
    ref = ssim_reference(x, y)
    assert out.shape == (B, C, H, W)
    assert jnp.allclose(out, ref, atol=5e-4, rtol=5e-4)

    # case 2: exercise the H-tiled (halo) path at a small scale
    kx2, ky2 = jax.random.split(ky)
    x2 = jax.random.uniform(kx2, (1, 2, 32, 16), dtype=jnp.float32)
    y2 = jax.random.uniform(ky2, (1, 2, 32, 16), dtype=jnp.float32)
    out2 = ssim_pallas(x2, y2, max_tile_h=8)
    jax.block_until_ready(out2)
    ref2 = ssim_reference(x2, y2)
    assert jnp.allclose(out2, ref2, atol=5e-4, rtol=5e-4)

    # case 3: exercise the block-banded (W-tiled) W-pass path
    kx3, ky3 = jax.random.split(kx2)
    x3 = jax.random.uniform(kx3, (1, 1, 16, 640), dtype=jnp.float32)
    y3 = jax.random.uniform(ky3, (1, 1, 16, 640), dtype=jnp.float32)
    out3 = ssim_pallas(x3, y3)
    jax.block_until_ready(out3)
    ref3 = ssim_reference(x3, y3)
    assert jnp.allclose(out3, ref3, atol=5e-4, rtol=5e-4)

    print("KERNEL_OK")
</pallas_src>

<mosaic_0001>
module attributes {stable_mosaic.version = 11 : i64} {
  func.func @kernel(%arg0: i32, %arg1: i32, %arg2: memref<1x16x16xf32, #tpu.memory_space<vmem>>, %arg3: memref<1x128x128xf32, #tpu.memory_space<vmem>>, %arg4: memref<4x16x128xf32, #tpu.memory_space<vmem>>, %arg5: memref<4x16x128xf32, #tpu.memory_space<vmem>>, %arg6: memref<4x16x128xf32, #tpu.memory_space<vmem>>) attributes {dimension_semantics = [#tpu.dimension_semantics<parallel>, #tpu.dimension_semantics<parallel>], iteration_bounds = array<i64: 2, 1>, scalar_prefetch = 0 : i64, scratch_operands = 0 : i64, tpu.core_type = #tpu.core_type<tc>, window_params = [{transform_indices = @transform_0, window_bounds = array<i64: 1, 16, 16>}, {pipeline_mode = #tpu.pipeline_mode<synchronous>, transform_indices = @transform_1, window_bounds = array<i64: 1, 128, 128>}, {transform_indices = @transform_2, window_bounds = array<i64: 4, 16, 128>}, {transform_indices = @transform_3, window_bounds = array<i64: 4, 16, 128>}, {transform_indices = @transform_4, window_bounds = array<i64: 4, 16, 128>}]} {
    %c0 = arith.constant 0 : index
    %c0_0 = arith.constant 0 : index
    %c0_1 = arith.constant 0 : index
    %0 = vector.load %arg2[%c0, %c0_0, %c0_1] : memref<1x16x16xf32, #tpu.memory_space<vmem>>, vector<1x16x16xf32>
    %1 = vector.shape_cast %0 : vector<1x16x16xf32> to vector<16x16xf32>
    %c0_2 = arith.constant 0 : index
    %c0_3 = arith.constant 0 : index
    %c0_4 = arith.constant 0 : index
    %2 = vector.load %arg4[%c0_2, %c0_3, %c0_4] : memref<4x16x128xf32, #tpu.memory_space<vmem>>, vector<1x16x128xf32>
    %3 = vector.shape_cast %2 : vector<1x16x128xf32> to vector<16x128xf32>
    %c0_5 = arith.constant 0 : index
    %c0_6 = arith.constant 0 : index
    %c0_7 = arith.constant 0 : index
    %4 = vector.load %arg5[%c0_5, %c0_6, %c0_7] : memref<4x16x128xf32, #tpu.memory_space<vmem>>, vector<1x16x128xf32>
    %5 = vector.shape_cast %4 : vector<1x16x128xf32> to vector<16x128xf32>
    %c1 = arith.constant 1 : index
    %c0_8 = arith.constant 0 : index
    %c0_9 = arith.constant 0 : index
    %6 = vector.load %arg4[%c1, %c0_8, %c0_9] : memref<4x16x128xf32, #tpu.memory_space<vmem>>, vector<1x16x128xf32>
    %7 = vector.shape_cast %6 : vector<1x16x128xf32> to vector<16x128xf32>
    %c1_10 = arith.constant 1 : index
    %c0_11 = arith.constant 0 : index
    %c0_12 = arith.constant 0 : index
    %8 = vector.load %arg5[%c1_10, %c0_11, %c0_12] : memref<4x16x128xf32, #tpu.memory_space<vmem>>, vector<1x16x128xf32>
    %9 = vector.shape_cast %8 : vector<1x16x128xf32> to vector<16x128xf32>
    %c2 = arith.constant 2 : index
    %c0_13 = arith.constant 0 : index
    %c0_14 = arith.constant 0 : index
    %10 = vector.load %arg4[%c2, %c0_13, %c0_14] : memref<4x16x128xf32, #tpu.memory_space<vmem>>, vector<1x16x128xf32>
    %11 = vector.shape_cast %10 : vector<1x16x128xf32> to vector<16x128xf32>
    %c2_15 = arith.constant 2 : index
    %c0_16 = arith.constant 0 : index
    %c0_17 = arith.constant 0 : index
    %12 = vector.load %arg5[%c2_15, %c0_16, %c0_17] : memref<4x16x128xf32, #tpu.memory_space<vmem>>, vector<1x16x128xf32>
    %13 = vector.shape_cast %12 : vector<1x16x128xf32> to vector<16x128xf32>
    %c3 = arith.constant 3 : index
    %c0_18 = arith.constant 0 : index
    %c0_19 = arith.constant 0 : index
    %14 = vector.load %arg4[%c3, %c0_18, %c0_19] : memref<4x16x128xf32, #tpu.memory_space<vmem>>, vector<1x16x128xf32>
    %15 = vector.shape_cast %14 : vector<1x16x128xf32> to vector<16x128xf32>
    %c3_20 = arith.constant 3 : index
    %c0_21 = arith.constant 0 : index
    %c0_22 = arith.constant 0 : index
    %16 = vector.load %arg5[%c3_20, %c0_21, %c0_22] : memref<4x16x128xf32, #tpu.memory_space<vmem>>, vector<1x16x128xf32>
    %17 = vector.shape_cast %16 : vector<1x16x128xf32> to vector<16x128xf32>
    %18 = arith.mulf %3, %3 : vector<16x128xf32>
    %19 = arith.mulf %7, %7 : vector<16x128xf32>
    %20 = arith.mulf %11, %11 : vector<16x128xf32>
    %21 = arith.mulf %15, %15 : vector<16x128xf32>
    %22 = arith.mulf %5, %5 : vector<16x128xf32>
    %23 = arith.mulf %9, %9 : vector<16x128xf32>
    %24 = arith.mulf %13, %13 : vector<16x128xf32>
    %25 = arith.mulf %17, %17 : vector<16x128xf32>
    %26 = arith.mulf %3, %5 : vector<16x128xf32>
    %27 = arith.mulf %7, %9 : vector<16x128xf32>
    %28 = arith.mulf %11, %13 : vector<16x128xf32>
    %29 = arith.mulf %15, %17 : vector<16x128xf32>
    %30 = tpu.concatenate %3, %7, %11, %15, %5, %9, %13, %17, %18, %19, %20, %21, %22, %23, %24, %25 in 1 : vector<16x128xf32>, vector<16x128xf32>, vector<16x128xf32>, vector<16x128xf32>, vector<16x128xf32>, vector<16x128xf32>, vector<16x128xf32>, vector<16x128xf32>, vector<16x128xf32>, vector<16x128xf32>, vector<16x128xf32>, vector<16x128xf32>, vector<16x128xf32>, vector<16x128xf32>, vector<16x128xf32>, vector<16x128xf32> -> vector<16x2048xf32>
    %31 = tpu.concatenate %26, %27, %28, %29 in 1 : vector<16x128xf32>, vector<16x128xf32>, vector<16x128xf32>, vector<16x128xf32> -> vector<16x512xf32>
    %32 = tpu.concatenate %30, %31 in 1 : vector<16x2048xf32>, vector<16x512xf32> -> vector<16x2560xf32>
    %cst = arith.constant dense<0.000000e+00> : vector<16x2560xf32>
    %33 = tpu.matmul %1, %32, %cst {dimension_numbers = #tpu.dot_dimension_numbers<[1], [0], [0], [1], [0, 0, 1, 1], [], []>} : vector<16x16xf32>, vector<16x2560xf32>, vector<16x2560xf32> -> vector<16x2560xf32>
    %34 = vector.extract_strided_slice %33 {offsets = [0, 0], sizes = [16, 128], strides = [1, 1]} : vector<16x2560xf32> to vector<16x128xf32>
    %35 = vector.extract_strided_slice %33 {offsets = [0, 128], sizes = [16, 128], strides = [1, 1]} : vector<16x2560xf32> to vector<16x128xf32>
    %36 = vector.extract_strided_slice %33 {offsets = [0, 256], sizes = [16, 128], strides = [1, 1]} : vector<16x2560xf32> to vector<16x128xf32>
    %37 = vector.extract_strided_slice %33 {offsets = [0, 384], sizes = [16, 128], strides = [1, 1]} : vector<16x2560xf32> to vector<16x128xf32>
    %38 = vector.extract_strided_slice %33 {offsets = [0, 512], sizes = [16, 128], strides = [1, 1]} : vector<16x2560xf32> to vector<16x128xf32>
    %39 = vector.extract_strided_slice %33 {offsets = [0, 640], sizes = [16, 128], strides = [1, 1]} : vector<16x2560xf32> to vector<16x128xf32>
    %40 = vector.extract_strided_slice %33 {offsets = [0, 768], sizes = [16, 128], strides = [1, 1]} : vector<16x2560xf32> to vector<16x128xf32>
    %41 = vector.extract_strided_slice %33 {offsets = [0, 896], sizes = [16, 128], strides = [1, 1]} : vector<16x2560xf32> to vector<16x128xf32>
    %42 = vector.extract_strided_slice %33 {offsets = [0, 1024], sizes = [16, 128], strides = [1, 1]} : vector<16x2560xf32> to vector<16x128xf32>
    %43 = vector.extract_strided_slice %33 {offsets = [0, 1152], sizes = [16, 128], strides = [1, 1]} : vector<16x2560xf32> to vector<16x128xf32>
    %44 = vector.extract_strided_slice %33 {offsets = [0, 1280], sizes = [16, 128], strides = [1, 1]} : vector<16x2560xf32> to vector<16x128xf32>
    %45 = vector.extract_strided_slice %33 {offsets = [0, 1408], sizes = [16, 128], strides = [1, 1]} : vector<16x2560xf32> to vector<16x128xf32>
    %46 = vector.extract_strided_slice %33 {offsets = [0, 1536], sizes = [16, 128], strides = [1, 1]} : vector<16x2560xf32> to vector<16x128xf32>
    %47 = vector.extract_strided_slice %33 {offsets = [0, 1664], sizes = [16, 128], strides = [1, 1]} : vector<16x2560xf32> to vector<16x128xf32>
    %48 = vector.extract_strided_slice %33 {offsets = [0, 1792], sizes = [16, 128], strides = [1, 1]} : vector<16x2560xf32> to vector<16x128xf32>
    %49 = vector.extract_strided_slice %33 {offsets = [0, 1920], sizes = [16, 128], strides = [1, 1]} : vector<16x2560xf32> to vector<16x128xf32>
    %50 = vector.extract_strided_slice %33 {offsets = [0, 2048], sizes = [16, 128], strides = [1, 1]} : vector<16x2560xf32> to vector<16x128xf32>
    %51 = vector.extract_strided_slice %33 {offsets = [0, 2176], sizes = [16, 128], strides = [1, 1]} : vector<16x2560xf32> to vector<16x128xf32>
    %52 = vector.extract_strided_slice %33 {offsets = [0, 2304], sizes = [16, 128], strides = [1, 1]} : vector<16x2560xf32> to vector<16x128xf32>
    %53 = vector.extract_strided_slice %33 {offsets = [0, 2432], sizes = [16, 128], strides = [1, 1]} : vector<16x2560xf32> to vector<16x128xf32>
    %54 = tpu.concatenate %34, %35, %36, %37, %38, %39, %40, %41, %42, %43, %44, %45, %46, %47, %48, %49 in 0 : vector<16x128xf32>, vector<16x128xf32>, vector<16x128xf32>, vector<16x128xf32>, vector<16x128xf32>, vector<16x128xf32>, vector<16x128xf32>, vector<16x128xf32>, vector<16x128xf32>, vector<16x128xf32>, vector<16x128xf32>, vector<16x128xf32>, vector<16x128xf32>, vector<16x128xf32>, vector<16x128xf32>, vector<16x128xf32> -> vector<256x128xf32>
    %55 = tpu.concatenate %50, %51, %52, %53 in 0 : vector<16x128xf32>, vector<16x128xf32>, vector<16x128xf32>, vector<16x128xf32> -> vector<64x128xf32>
    %56 = tpu.concatenate %54, %55 in 0 : vector<256x128xf32>, vector<64x128xf32> -> vector<320x128xf32>
    %c0_23 = arith.constant 0 : index
    %c0_24 = arith.constant 0 : index
    %c0_25 = arith.constant 0 : index
    %57 = vector.load %arg3[%c0_23, %c0_24, %c0_25] : memref<1x128x128xf32, #tpu.memory_space<vmem>>, vector<1x128x128xf32>
    %58 = vector.shape_cast %57 : vector<1x128x128xf32> to vector<128x128xf32>
    %cst_26 = arith.constant dense<0.000000e+00> : vector<320x128xf32>
    %59 = tpu.matmul %56, %58, %cst_26 {dimension_numbers = #tpu.dot_dimension_numbers<[1], [0], [0], [1], [0, 0, 1, 1], [], []>} : vector<320x128xf32>, vector<128x128xf32>, vector<320x128xf32> -> vector<320x128xf32>
    %60 = vector.extract_strided_slice %59 {offsets = [0, 0], sizes = [64, 128], strides = [1, 1]} : vector<320x128xf32> to vector<64x128xf32>
    %61 = vector.extract_strided_slice %59 {offsets = [64, 0], sizes = [64, 128], strides = [1, 1]} : vector<320x128xf32> to vector<64x128xf32>
    %62 = vector.extract_strided_slice %59 {offsets = [128, 0], sizes = [64, 128], strides = [1, 1]} : vector<320x128xf32> to vector<64x128xf32>
    %63 = vector.extract_strided_slice %59 {offsets = [192, 0], sizes = [64, 128], strides = [1, 1]} : vector<320x128xf32> to vector<64x128xf32>
    %64 = vector.extract_strided_slice %59 {offsets = [256, 0], sizes = [64, 128], strides = [1, 1]} : vector<320x128xf32> to vector<64x128xf32>
    %65 = arith.mulf %60, %60 : vector<64x128xf32>
    %66 = arith.subf %62, %65 : vector<64x128xf32>
    %67 = arith.mulf %61, %61 : vector<64x128xf32>
    %68 = arith.subf %63, %67 : vector<64x128xf32>
    %69 = arith.mulf %60, %61 : vector<64x128xf32>
    %70 = arith.subf %64, %69 : vector<64x128xf32>
    %cst_27 = arith.constant 2.000000e+00 : f32
    %71 = vector.broadcast %cst_27 : f32 to vector<64x128xf32>
    %72 = arith.mulf %71, %60 : vector<64x128xf32>
    %73 = arith.mulf %72, %61 : vector<64x128xf32>
    %cst_28 = arith.constant 9.99999974E-5 : f32
    %74 = vector.broadcast %cst_28 : f32 to vector<64x128xf32>
    %75 = arith.addf %73, %74 : vector<64x128xf32>
    %cst_29 = arith.constant 2.000000e+00 : f32
    %76 = vector.broadcast %cst_29 : f32 to vector<64x128xf32>
    %77 = arith.mulf %76, %70 : vector<64x128xf32>
    %cst_30 = arith.constant 8.99999984E-4 : f32
    %78 = vector.broadcast %cst_30 : f32 to vector<64x128xf32>
    %79 = arith.addf %77, %78 : vector<64x128xf32>
    %80 = arith.mulf %75, %79 : vector<64x128xf32>
    %81 = arith.mulf %60, %60 : vector<64x128xf32>
    %82 = arith.mulf %61, %61 : vector<64x128xf32>
    %83 = arith.addf %81, %82 : vector<64x128xf32>
    %cst_31 = arith.constant 9.99999974E-5 : f32
    %84 = vector.broadcast %cst_31 : f32 to vector<64x128xf32>
    %85 = arith.addf %83, %84 : vector<64x128xf32>
    %86 = arith.addf %66, %68 : vector<64x128xf32>
    %cst_32 = arith.constant 8.99999984E-4 : f32
    %87 = vector.broadcast %cst_32 : f32 to vector<64x128xf32>
    %88 = arith.addf %86, %87 : vector<64x128xf32>
    %89 = arith.mulf %85, %88 : vector<64x128xf32>
    %90 = tpu.reciprocal %89 : vector<64x128xf32> -> vector<64x128xf32>
    %91 = arith.mulf %80, %90 : vector<64x128xf32>
    %cst_33 = arith.constant 1.000000e+00 : f32
    %92 = vector.broadcast %cst_33 : f32 to vector<64x128xf32>
    %93 = arith.subf %92, %91 : vector<64x128xf32>
    %cst_34 = arith.constant 5.000000e-01 : f32
    %94 = vector.broadcast %cst_34 : f32 to vector<64x128xf32>
    %95 = arith.mulf %93, %94 : vector<64x128xf32>
    %cst_35 = arith.constant 0.000000e+00 : f32
    %cst_36 = arith.constant 1.000000e+00 : f32
    %96 = vector.broadcast %cst_35 : f32 to vector<64x128xf32>
    %97 = arith.maximumf %96, %95 : vector<64x128xf32>
    %98 = vector.broadcast %cst_36 : f32 to vector<64x128xf32>
    %99 = arith.minimumf %98, %97 : vector<64x128xf32>
    %100 = vector.shape_cast %99 : vector<64x128xf32> to vector<4x16x128xf32>
    %c0_37 = arith.constant 0 : index
    %c0_38 = arith.constant 0 : index
    %c0_39 = arith.constant 0 : index
    %101 = vector.load %arg6[%c0_37, %c0_38, %c0_39] : memref<4x16x128xf32, #tpu.memory_space<vmem>>, vector<4x16x128xf32>
    tpu.vector_store %arg6[%c0_37, %c0_38, %c0_39], %100 {strides = array<i32>} : memref<4x16x128xf32, #tpu.memory_space<vmem>>, vector<4x16x128xf32>,
    return
  }
  func.func @transform_0(%arg0: i32, %arg1: i32) -> (i32, i32, i32) {
    %c0_i32 = arith.constant 0 : i32
    %c0_i32_0 = arith.constant 0 : i32
    %c0_i32_1 = arith.constant 0 : i32
    return %arg1, %c0_i32, %c0_i32_0 : i32, i32, i32
  }
  func.func @transform_1(%arg0: i32, %arg1: i32) -> (i32, i32, i32) {
    %c0_i32 = arith.constant 0 : i32
    %c0_i32_0 = arith.constant 0 : i32
    %c0_i32_1 = arith.constant 0 : i32
    %c0_i32_2 = arith.constant 0 : i32
    return %c0_i32, %c0_i32_0, %c0_i32_1 : i32, i32, i32
  }
  func.func @transform_2(%arg0: i32, %arg1: i32) -> (i32, i32, i32) {
    %c0_i32 = arith.constant 0 : i32
    %c0_i32_0 = arith.constant 0 : i32
    return %arg0, %arg1, %c0_i32 : i32, i32, i32
  }
  func.func @transform_3(%arg0: i32, %arg1: i32) -> (i32, i32, i32) {
    %c0_i32 = arith.constant 0 : i32
    %c0_i32_0 = arith.constant 0 : i32
    return %arg0, %arg1, %c0_i32 : i32, i32, i32
  }
  func.func @transform_4(%arg0: i32, %arg1: i32) -> (i32, i32, i32) {
    %c0_i32 = arith.constant 0 : i32
    %c0_i32_0 = arith.constant 0 : i32
    return %arg0, %arg1, %c0_i32 : i32, i32, i32
  }
}

</mosaic_0001>

<bundles_post_ra>
// kernel: tpu_custom_call.1
= control target key start
LH: loop header
LB: loop body
LE: loop exit
PB: predicated region body
PF: predicated region fallthrough
CT: control target
= control target key end

     0   :  { %s3035_s0 = inlined_call_operand.hbm [shape: f32[1,16,16], index: 0, kind: input, shape index: {}]   ;;  %s3036_s1 = inlined_call_operand.hbm [shape: f32[1,128,128], index: 1, kind: input, shape index: {}]   ;;  %s3037_s2 = inlined_call_operand.hbm [shape: f32[8,16,128], index: 2, kind: input, shape index: {}]   ;;  %s3038_s3 = inlined_call_operand.hbm [shape: f32[8,16,128], index: 3, kind: input, shape index: {}]   ;;  %s3039_s4 = inlined_call_operand.hbm [shape: f32[8,16,128], index: 4, kind: output, shape index: {}]  }
   0x1   :  { %3053 = sst [smem:[#allocation19_spill]] %s3035_s0 }
   0x2   :  { %3054 = sst [smem:[#allocation20_spill]] %s3037_s2 }
   0x3   :  { %3055 = sst [smem:[#allocation21_spill]] %s3039_s4 }
   0x4   :  { %9 = vsyncpa [#allocation3], 0 }
   0x5   :  { %10 = vsyncpa [#allocation6], 0 }
   0x6   :  { %11 = vsyncpa [#allocation4], 0 }
   0x7   :  { %13 = vsyncpa [#allocation4 + $0x1], 0  ;;  %s2416_s15 = smov 0   ;;  %s2418_s16 = smov 0  }
   0x8   :  { %s2420_s17 = smov 0   ;;  %s2422_s18 = smov 0  }
   0x9   :  { %s2424_s19 = smov 0   ;;  %s2426_s20 = smov 0  }
   0xa LB: > { %3056 = sst [smem:[#allocation14_spill]] %s2359_s15  ;;  %s2447_s21 = sadd.s32 4294967295, %s2379_s20   ;;  %s2379_s20 = sphi %s2426_s20, %s19_s20   ;;  %s2375_s19 = sphi %s2424_s19, %s3096_s19   ;;  %s2371_s18 = sphi %s2422_s18, %s3095_s18   ;;  %s2367_s17 = sphi %s2420_s17, %s3091_s17   ;;  %s2363_s16 = sphi %s2418_s16, %s3094_s16   ;;  %s2359_s15 = sphi %s2416_s15, %s3093_s15  }
   0xb   : > { %3057 = sst [smem:[#allocation15_spill]] %s2367_s17  ;;  %s1765_s22 = sadd.s32 4294967294, %s2379_s20  }
   0xc   : > { %p94_p0 = scmp.ne.s32.totalorder %s2367_s17, %s2363_s16  ;;  %p95_p1 = scmp.eq.s32.totalorder %s2379_s20, 0 }
   0xd   : > { %p100_p2 = scmp.ne.s32.totalorder %s2363_s16, %s2359_s15  ;;  %p3040_p3 = scmp.eq.s32.totalorder %s2447_s21, 0 }
   0xe   : > { %p154_p4 = scmp.eq.s32.totalorder %s2447_s21, 1  ;;  %p2458_p5 = por %p95_p1, %p94_p0 }
   0xf   : > { %p160_p6 = scmp.eq.s32.totalorder %s1765_s22, 1  ;;  %p2464_p7 = por %p3040_p3, %p100_p2 }
  0x10   : > { %p2468_p8 = por %p154_p4, %p94_p0  ;;  %p1766_p10 = scmp.ge.s32.totalorder %s2379_s20, 1 }
  0x11   : > { %s3059_s25 = scalar_select %p2464_p7, 1, 0 }
  0x12   : > { %s3060_s26 = scalar_select %p2468_p8, 1, 0 }
  0x13   : > { %p2472_p9 = por %p160_p6, %p100_p2  ;;  %p167_p11 = scmp.lt.s32.totalorder %s2379_s20, 3 }
  0x14   : > { %s2381_s29 = smov [#allocation2]   ;;  %p2098_p1 = scmp.lt.s32.totalorder %s2379_s20, 2 }
  0x15   : > { %s3061_s27 = scalar_select %p2472_p9, 1, 0 }
  0x16   : > { %p2478_p12 = pnand %p1766_p10, %p167_p11  ;;  %s182_s30 = sshll.u32 %s2381_s29, 4  ;;  %s2482_s30 = int_to_ptr.vmem [resolvable:$true] %s182_s30 }
  0x17   : > { %3062 = sst [smem:[#allocation16_spill]] %s3061_s27  ;;  %p2496_p4 = pnand %p2098_p1, %p2458_p5 }
  0x18   : > { %s3063_s28 = scalar_select %p2478_p12, 1, 0 }
  0x19   : > { %p2078_p13 = pneg %p2478_p12  ;;  %s31_s7 = sadd.s32 1, %s2375_s19 }
  0x1a   : > { %s3065_s6 = scalar_select %p2496_p4, 1, 0 }
  0x1b   : > { %p2490_p2 = pnand %p2078_p13, %p3040_p3  ;;  %p2501_p6 = scmp.ge.s32.totalorder %s31_s7, 2 }
  0x1c   : > { %s3067_s0 = sld [smem:[#allocation19_spill]] }
  0x1d   : > { %p3047_p11 = pneg %p2490_p2 }
  0x22   : > { %s2173_s11 = scalar_lea.hbm %s3067_s0, 256 }
  0x23   : > { %p2174_p10 = scmp.ne.s32.totalorder %s3067_s0, %s2173_s11  ;;  %p2180_p1 = scmp.lt.u32.totalorder %s2173_s11, %s3067_s0 }
  0x25   : > { %p2176_p5 = pnand %p3047_p11, %p2174_p10 }
  0x27   : > { %p2177_p13 = pneg %p2176_p5 }
  0x29   : > { %p2182_p0 = pnand %p2180_p1, %p2177_p13 }
  0x2b   : > { %2185 = shalt.err (!%p2182_p0)
}
  0x2c   : > { %s2186_s24 = scalar_lea.vmem %s2482_s30, 256  ;;  %p2194_p7 = scmp.lt.s32.totalorder %s2482_s30, %s2482_s30 }
  0x2d   : > { %p2187_p3 = scmp.ne.s32.totalorder %s2482_s30, %s2186_s24  ;;  %p2195_p10 = scmp.lt.s32.totalorder %s2186_s24, %s2186_s24 }
  0x2f   : > { %p2189_p9 = pnand %p2187_p3, %p3047_p11  ;;  %p2196_p5 = por %p2195_p10, %p2194_p7 }
  0x31   : > { %p2190_p8 = pneg %p2189_p9 }
  0x33   : > { %p2197_p12 = pnand %p2196_p5, %p2190_p8 }
  0x35   : > { %2200 = shalt.err (!%p2197_p12)
}
  0x36   : > { %s2382_s29 = smov 128   ;;  %s2383_s9 = smov 8  }
  0x37   : > { %2081 = dma.hbm_to_vmem [thread:$0]  (!%p2490_p2), %s3067_s0, 256, %s2482_s30, [#allocation3], %s2382_s29, %s2382_s29, %s2383_s9  }
  0x38   : > { %s209_s12 = sand.u32 1, %s2379_s20   ;;  %s3098_s7 = smov (%p2501_p6, %s31_s7), 0 }
  0x39   : > { %3068 = sst [smem:[#allocation17_spill]] %s3098_s7  ;;  %s211_s13 = sand.u32 1, %s2367_s17  }
  0x3a   : > { %s82_s14 = ssub.s32 %s2375_s19, %s3098_s7  ;;  %s2543_s22 = sshll.u32 %s211_s13, 6 }
  0x3b   : > { %p85_p3 = scmp.eq.s32.totalorder %s82_s14, 0  ;;  %s1823_s24 = sshll.u32 %s2375_s19, 10 }
  0x3c   : > { %s213_s23 = scalar_lea.vmem [#allocation7], %s2543_s22  ;;  %s3069_s15 = sadd.s32 1, %s2367_s17 }
  0x3d   : > { %s223_s27 = sshll.u32 %s213_s23, 4  ;;  %s3071_s2 = sld [smem:[#allocation20_spill]]  ;;  %s2559_s27 = int_to_ptr.vmem [resolvable:$true] %s223_s27 }
  0x3e   : > { %s2550_s4 = scalar_select %p85_p3, %s2367_s17, %s3069_s15  }
  0x3f   : > { %s2561_s11 = scalar_lea.sflag [#allocation3], %s209_s12  ;;  %p3050_p8 = pneg %p2496_p4 }
  0x40   : > { %3070 = sst [smem:[#allocation18_spill]] %s2550_s4 }
  0x43   : > { %s2557_s8 = scalar_lea.hbm %s3071_s2, %s1823_s24  ;;  %s2206_s14 = scalar_lea.hbm %s3071_s2, 2048 }
  0x44   : > { %s2201_s13 = scalar_lea.hbm %s2557_s8, 1024  ;;  %p2207_p0 = scmp.lt.u32.totalorder %s2557_s8, %s3071_s2 }
  0x45   : > { %p2202_p7 = scmp.ne.s32.totalorder %s2557_s8, %s2201_s13  ;;  %p2208_p6 = scmp.lt.u32.totalorder %s2206_s14, %s2201_s13 }
  0x46   : > { %p2210_p1 = scmp.lt.u32.totalorder %s2201_s13, %s2557_s8 }
  0x47   : > { %p2204_p9 = pnand %p3050_p8, %p2202_p7  ;;  %p2209_p13 = por %p2208_p6, %p2207_p0 }
  0x49   : > { %p2205_p12 = pneg %p2204_p9  ;;  %p2211_p10 = por %p2210_p1, %p2209_p13 }
  0x4b   : > { %p2212_p5 = pnand %p2211_p10, %p2205_p12 }
  0x4d   : > { %2215 = shalt.err (!%p2212_p5)
}
  0x4e   : > { %s2216_s12 = scalar_lea.vmem %s2559_s27, 1024  ;;  %s2384_s15 = smov [#allocation7]  }
  0x4f   : > { %p2217_p3 = scmp.ne.s32.totalorder %s2559_s27, %s2216_s12  ;;  %s2221_s23 = sshll.u32 %s2384_s15, 4  ;;  %s2222_s23 = int_to_ptr.vmem [resolvable:$false] %s2221_s23 }
  0x50   : > { %s2223_s30 = scalar_lea.vmem %s2222_s23, 2048  ;;  %p2224_p11 = scmp.lt.s32.totalorder %s2559_s27, %s2222_s23 }
  0x51   : > { %p2219_p7 = pnand %p2217_p3, %p3050_p8  ;;  %p2225_p0 = scmp.lt.s32.totalorder %s2223_s30, %s2216_s12 }
  0x53   : > { %p2220_p9 = pneg %p2219_p7  ;;  %p2226_p6 = por %p2225_p0, %p2224_p11 }
  0x55   : > { %p2227_p13 = pnand %p2226_p6, %p2220_p9 }
  0x57   : > { %2230 = shalt.err (!%p2227_p13)
}
  0x58   : > { %2088 = dma.hbm_to_vmem [thread:$0]  (!%p2496_p4), %s2557_s8, 1024, %s2559_s27, %s2561_s11, %s2382_s29, %s2382_s29, %s2383_s9  }
  0x59   : > { %s2385_s13 = smov [#allocation5]   ;;  %s2597_s15 = scalar_lea.hbm %s3038_s3, %s1823_s24 }
  0x5a   : > { %s195_s14 = sshll.u32 %s2385_s13, 4  ;;  %s237_s23 = scalar_lea.vmem [#allocation8], %s2543_s22  ;;  %s196_s14 = int_to_ptr.vmem [resolvable:$true] %s195_s14 }
  0x5b   : > { %s247_s30 = sshll.u32 %s237_s23, 4  ;;  %s2231_s7 = scalar_lea.hbm %s3036_s1, 2048  ;;  %s2623_s30 = int_to_ptr.vmem [resolvable:$true] %s247_s30 }
  0x5c   : > { %p2232_p11 = scmp.ne.s32.totalorder %s3036_s1, %s2231_s7  ;;  %p3072_p12 = pneg %p2490_p2 }
  0x5d   : > { %p2238_p5 = scmp.lt.u32.totalorder %s2231_s7, %s3036_s1 }
  0x5e   : > { %p2234_p1 = pnand %p2232_p11, %p3072_p12 }
  0x60   : > { %p2235_p10 = pneg %p2234_p1 }
  0x62   : > { %p2240_p3 = pnand %p2238_p5, %p2235_p10 }
  0x64   : > { %2243 = shalt.err (!%p2240_p3)
}
  0x65   : > { %s2244_s22 = scalar_lea.vmem %s196_s14, 2048  ;;  %p3073_p9 = pmov %p3072_p12 }
  0x66   : > { %p2245_p7 = scmp.ne.s32.totalorder %s196_s14, %s2244_s22  ;;  %p2252_p13 = scmp.lt.s32.totalorder %s196_s14, %s196_s14 }
  0x67   : > { %p2253_p8 = scmp.lt.s32.totalorder %s2244_s22, %s2244_s22 }
  0x68   : > { %p2247_p0 = pnand %p2245_p7, %p3073_p9 }
  0x69   : > { %p2254_p4 = por %p2253_p8, %p2252_p13 }
  0x6a   : > { %p2248_p6 = pneg %p2247_p0 }
  0x6c   : > { %p2255_p11 = pnand %p2254_p4, %p2248_p6 }
  0x6e   : > { %2258 = shalt.err (!%p2255_p11)
}
  0x6f   : > { %2084 = dma.hbm_to_vmem [thread:$0]  (!%p2490_p2), %s3036_s1, 2048, %s196_s14, [#allocation6], %s2382_s29, %s2382_s29, %s2383_s9  }
  0x70   : > { %s2259_s4 = scalar_lea.hbm %s2597_s15, 1024  ;;  %p3074_p4 = scmp.ne.s32.totalorder %s3065_s6, 0 }
  0x71   : > { %p2260_p8 = scmp.ne.s32.totalorder %s2597_s15, %s2259_s4  ;;  %s2264_s7 = scalar_lea.hbm %s3038_s3, 2048 }
  0x72   : > { %p3075_p12 = pneg %p3074_p4  ;;  %p2265_p5 = scmp.lt.u32.totalorder %s2597_s15, %s3038_s3 }
  0x73   : > { %p2266_p3 = scmp.lt.u32.totalorder %s2264_s7, %s2259_s4  ;;  %p2268_p9 = scmp.lt.u32.totalorder %s2259_s4, %s2597_s15 }
  0x74   : > { %p2262_p1 = pnand %p2260_p8, %p3075_p12 }
  0x75   : > { %p2267_p7 = por %p2266_p3, %p2265_p5 }
  0x76   : > { %p2263_p10 = pneg %p2262_p1 }
  0x77   : > { %p2269_p2 = por %p2268_p9, %p2267_p7 }
  0x79   : > { %p2270_p0 = pnand %p2269_p2, %p2263_p10 }
  0x7b   : > { %2273 = shalt.err (!%p2270_p0)
}
  0x7c   : > { %s2274_s14 = scalar_lea.vmem %s2623_s30, 1024  ;;  %p3076_p13 = pmov %p3075_p12 }
  0x7d   : > { %p2275_p6 = scmp.ne.s32.totalorder %s2623_s30, %s2274_s14  ;;  %s2386_s10 = smov [#allocation8]  }
  0x7e   : > { %s2279_s12 = sshll.u32 %s2386_s10, 4  ;;  %s2280_s12 = int_to_ptr.vmem [resolvable:$false] %s2279_s12 }
  0x7f   : > { %p2277_p11 = pnand %p2275_p6, %p3076_p13  ;;  %s2281_s23 = scalar_lea.vmem %s2280_s12, 2048 }
  0x80   : > { %p2282_p12 = scmp.lt.s32.totalorder %s2623_s30, %s2280_s12  ;;  %p2283_p1 = scmp.lt.s32.totalorder %s2281_s23, %s2274_s14 }
  0x81   : > { %p2278_p8 = pneg %p2277_p11 }
  0x82   : > { %p2284_p5 = por %p2283_p1, %p2282_p12 }
  0x84   : > { %p2285_p3 = pnand %p2284_p5, %p2278_p8 }
  0x86   : > { %2288 = shalt.err (!%p2285_p3)
}
  0x87   : > { %2091 = dma.hbm_to_vmem [thread:$0]  (!%p3074_p4), %s2597_s15, 1024, %s2623_s30, %s2561_s11, %s2382_s29, %s2382_s29, %s2383_s9  }
  0x88   : > { %p3077_p10 = scmp.ne.s32.totalorder %s3063_s28, 0 }
  0x89   : > { %p3078_p7 = scmp.eq.s32.totalorder (!%p3077_p10), %s2447_s21, 0 }
  0x8a   : > { %259 = sbr.rel (%p3077_p10) target bundleno = 679 (0x2a7), region = 36 }
  0x91   : > { %2342 = dma.done.wait (%p3078_p7), [#allocation3], 256   ;;  %p3079_p9 = pmov %p3078_p7 }
  0x92   : > { %p3080_p2 = pmov %p3078_p7 }
  0x93   : > { %2344 = vsyncadd (%p3079_p9), [#allocation3], 4294967040 }
  0x94   : > { %2346 = dma.done.wait (%p3080_p2), [#allocation6], 2048   ;;  %p3081_p0 = pmov %p3080_p2 }
  0x95   : > { %s269_s6 = sand.u32 1, %s2447_s21   ;;  %s271_s29 = sand.u32 1, %s2363_s16  }
  0x96   : > { %2348 = vsyncadd (%p3081_p0), [#allocation6], 4294965248  ;;  %s2666_s28 = sshll.u32 %s271_s29, 6  ;;  %s270_s9 = scalar_lea.sflag [#allocation3], %s269_s6 }
  0x97   : > { %s273_s11 = scalar_lea.vmem [#allocation7], %s2666_s28  ;;  %p3082_p4 = scmp.ne.s32.totalorder %s3059_s25, 0 }
  0x99   : > { %2350 = dma.done.wait (%p3082_p4), %s270_s9, 2048  }
  0x9a   : > { %2352 = vsyncadd (%p3082_p4), %s270_s9, 4294965248  ;;  %v2387_v0 = vmov 0.0   ;;  %v2675_v1 = vld [vmem:[%s273_s11 + $0x10] sm:$0xff]  ;;  %v2677_v2 = vld [vmem:[%s273_s11 + $0x18] sm:$0xff]  ;;  %s282_s21 = scalar_lea.vmem [#allocation8], %s2666_s28  ;;  %vm366_vm0 = vcmask 130048  }
  0x9b   : > { %437 = vmatprep.mubr.f32.mxu0 %v2387_v0  ;;  %514 = vmatprep.mubr.f32.mxu1 %v2387_v0  ;;  %v2680_v3 = vld [vmem:[%s282_s21 + $0x10] sm:$0xff]  ;;  %v2682_v4 = vld [vmem:[%s282_s21 + $0x18] sm:$0xff]  ;;  %v1976_v5 = vpack.c.bf16 %v2677_v2, %v2675_v1  ;;  %v2696_v11 = vld [vmem:[%s273_s11] sm:$0xff]  ;;  %v344_v16 = vmul.f32 %v2675_v1, %v2675_v1  ;;  %v345_v17 = vmul.f32 %v2677_v2, %v2677_v2  ;;  %s2967_s25 = scalar_lea.vmem [#allocation9], %s2666_s28  ;;  %s1827_s15 = sshll.u32 %s2371_s18, 10 }
  0x9c   : > { %v2686_v6 = vld [vmem:[%s273_s11 + $0x30] sm:$0xff]  ;;  %v2688_v7 = vld [vmem:[%s273_s11 + $0x38] sm:$0xff]  ;;  %v2698_v12 = vld [vmem:[%s273_s11 + $0x8] sm:$0xff]  ;;  %v1984_v15 = vpack.c.bf16 %v2682_v4, %v2680_v3  ;;  %v342_v32 = vmul.f32 %v2696_v11, %v2696_v11  ;;  %v352_v37 = vmul.f32 %v2680_v3, %v2680_v3  ;;  %v353_v38 = vmul.f32 %v2682_v4, %v2682_v4  ;;  %s1633_s30 = sshll.u32 %s2967_s25, 4  ;;  %s3084_s22 = sld [smem:[#allocation21_spill]]  ;;  %s2982_s30 = int_to_ptr.vmem [resolvable:$true] %s1633_s30 }
  0x9d   : > { %v2690_v8 = vld [vmem:[%s282_s21 + $0x30] sm:$0xff]  ;;  %v2692_v9 = vld [vmem:[%s282_s21 + $0x38] sm:$0xff]  ;;  %v1980_v10 = vpack.c.bf16 %v2688_v7, %v2686_v6  ;;  %1977 = vmatprep.subr.bf16.mxu0 %v1976_v5  ;;  %v2700_v13 = vld [vmem:[%s282_s21] sm:$0xff]  ;;  %v1978_v18 = vpack.c.bf16 %v2698_v12, %v2696_v11  ;;  %v348_v22 = vmul.f32 %v2686_v6, %v2686_v6  ;;  %v349_v23 = vmul.f32 %v2688_v7, %v2688_v7  ;;  %s2988_s18 = scalar_lea.sflag [#allocation4], %s271_s29  ;;  %s2289_s2 = scalar_lea.vmem %s2982_s30, 1024 }
  0x9e   : > { %v2702_v14 = vld [vmem:[%s282_s21 + $0x8] sm:$0xff]  ;;  %v2712_v19 = vld [vmem:[%s273_s11 + $0x20] sm:$0xff]  ;;  %v2726_v26 = vld [vmem:[#allocation2] sm:$0xff]  ;;  %v1988_v27 = vpack.c.bf16 %v2692_v9, %v2690_v8  ;;  %v1992_v30 = vpack.c.bf16 %v345_v17, %v344_v16  ;;  %v343_v33 = vmul.f32 %v2698_v12, %v2698_v12  ;;  %v356_v39 = vmul.f32 %v2690_v8, %v2690_v8  ;;  %p2290_p6 = scmp.ne.s32.totalorder %s2982_s30, %s2289_s2  ;;  %p3085_p13 = scmp.ne.s32.totalorder %s3060_s26, 0 }
  0x9f   : > { %1981 = vmatprep.subr.bf16.mxu1 %v1980_v10  ;;  %v2714_v20 = vld [vmem:[%s273_s11 + $0x28] sm:$0xff]  ;;  %v2716_v21 = vld [vmem:[%s282_s21 + $0x20] sm:$0xff]  ;;  %1979 = vmatpush1.bf16.msra.mxu0 %v1978_v18  ;;  %v1986_v28 = vpack.c.bf16 %v2702_v14, %v2700_v13  ;;  %v1996_v31 = vpack.c.bf16 %v349_v23, %v348_v22  ;;  %v2742_v34 = vld [vmem:[#allocation2 + $0x8] sm:$0xff]  ;;  %v346_v35 = vmul.f32 %v2712_v19, %v2712_v19  ;;  %s2388_s4 = smov [#allocation9]  }
  0xa0   : > { %v2722_v24 = vld [vmem:[%s282_s21 + $0x28] sm:$0xff]  ;;  %v1982_v25 = vpack.c.bf16 %v2714_v20, %v2712_v19  ;;  %1985 = vmatprep.subr.bf16.mxu0 %v1984_v15  ;;  %v347_v36 = vmul.f32 %v2714_v20, %v2714_v20  ;;  %v357_v40 = vmul.f32 %v2692_v9, %v2692_v9  ;;  %v1994_v41 = vpack.c.bf16 %v343_v33, %v342_v32  ;;  %v1143_v61 = vld [vmem:[#allocation5] sm:$0xff]  ;;  %v1150_v10 = vld [vmem:[#allocation5 + $0x38] sm:$0xff]  ;;  %p2291_p11 = pnand %p2290_p6, %p3085_p13  ;;  %s2293_s17 = sshll.u32 %s2388_s4, 4  ;;  %s2294_s17 = int_to_ptr.vmem [resolvable:$false] %s2293_s17 }
  0xa1   : > { %v1990_v29 = vpack.c.bf16 %v2722_v24, %v2716_v21  ;;  %v2000_v43 = vpack.c.bf16 %v353_v38, %v352_v37  ;;  %v350_v45 = vmul.f32 %v2700_v13, %v2700_v13  ;;  %v351_v46 = vmul.f32 %v2702_v14, %v2702_v14  ;;  %v1144_v62 = vld [vmem:[#allocation5 + $0x8] sm:$0xff]  ;;  %v1154_v15 = vld [vmem:[#allocation5 + $0x58] sm:$0xff]  ;;  %v1155_v17 = vld [vmem:[#allocation5 + $0x60] sm:$0xff]  ;;  %s2295_s5 = scalar_lea.vmem %s2294_s17, 2048  ;;  %p2296_p12 = scmp.lt.s32.totalorder %s2982_s30, %s2294_s17 }
  0xa2   : > { %1983 = vmatpush1.bf16.msra.mxu1 %v1982_v25  ;;  %1796 = vmatmul.mubr.msk.f32.vlgmr.msra.gmra.mrb[0].mxu0 %vm366_vm0, %v2726_v26  ;;  %v1998_v42 = vpack.c.bf16 %v347_v36, %v346_v35  ;;  %v2004_v44 = vpack.c.bf16 %v357_v40, %v356_v39  ;;  %v360_v47 = vmul.f32 %v2680_v3, %v2675_v1  ;;  %v1145_v3 = vld [vmem:[#allocation5 + $0x10] sm:$0xff]  ;;  %v1156_v18 = vld [vmem:[#allocation5 + $0x68] sm:$0xff]  ;;  %s2980_s0 = scalar_lea.hbm %s3084_s22, %s1827_s15  ;;  %p2292_p8 = pneg %p2291_p11 }
  0xa3   : > { %1989 = vmatprep.subr.bf16.mxu1 %v1988_v27  ;;  %1987 = vmatpush1.bf16.msra.mxu0 %v1986_v28  ;;  %v361_v48 = vmul.f32 %v2682_v4, %v2677_v2  ;;  %v354_v49 = vmul.f32 %v2716_v21, %v2716_v21  ;;  %v355_v50 = vmul.f32 %v2722_v24, %v2722_v24  ;;  %v1146_v4 = vld [vmem:[#allocation5 + $0x18] sm:$0xff]  ;;  %p2297_p1 = scmp.lt.s32.totalorder %s2295_s5, %s2289_s2 }
  0xa4   : > { %443 = vmatprep.mubr.f32.mxu0 %v2387_v0  ;;  %1993 = vmatprep.subr.bf16.mxu0 %v1992_v30  ;;  %v364_v51 = vmul.f32 %v2690_v8, %v2686_v6  ;;  %v365_v52 = vmul.f32 %v2692_v9, %v2688_v7  ;;  %v2002_v53 = vpack.c.bf16 %v351_v46, %v350_v45  ;;  %v1147_v6 = vld [vmem:[#allocation5 + $0x20] sm:$0xff]  ;;  %v1148_v7 = vld [vmem:[#allocation5 + $0x28] sm:$0xff]  ;;  %v1149_v9 = vld [vmem:[#allocation5 + $0x30] sm:$0xff] }
  0xa5   : > { %1798 = vmatmul.mubr.msk.f32.vlgmr.msra.gmra.mrb[0].mxu1 %vm366_vm0, %v2726_v26  ;;  %v2006_v54 = vpack.c.bf16 %v355_v50, %v354_v49  ;;  %v2008_v55 = vpack.c.bf16 %v361_v48, %v360_v47  ;;  %v358_v57 = vmul.f32 %v2700_v13, %v2696_v11  ;;  %v359_v58 = vmul.f32 %v2702_v14, %v2698_v12  ;;  %v1151_v12 = vld [vmem:[#allocation5 + $0x40] sm:$0xff]  ;;  %v1152_v13 = vld [vmem:[#allocation5 + $0x48] sm:$0xff]  ;;  %v1153_v14 = vld [vmem:[#allocation5 + $0x50] sm:$0xff]  ;;  %p2298_p5 = por %p2297_p1, %p2296_p12 }
  0xa6   : > { %1991 = vmatpush1.bf16.msra.mxu1 %v1990_v29  ;;  %520 = vmatprep.mubr.f32.mxu1 %v2387_v0  ;;  %v2012_v56 = vpack.c.bf16 %v365_v52, %v364_v51  ;;  %v362_v59 = vmul.f32 %v2716_v21, %v2712_v19  ;;  %v363_v60 = vmul.f32 %v2722_v24, %v2714_v20  ;;  %v1157_v20 = vld [vmem:[#allocation5 + $0x70] sm:$0xff]  ;;  %v1158_v21 = vld [vmem:[#allocation5 + $0x78] sm:$0xff] }
  0xa7   : > { %1797 = vmatmul.mubr.msk.f32.gmra.mrb[2].mxu0 %vm366_vm0, %v2742_v34  ;;  %1997 = vmatprep.subr.bf16.mxu1 %v1996_v31  ;;  %v2010_v63 = vpack.c.bf16 %v359_v58, %v358_v57  ;;  %v2016_v2 = vpack.c.bf16 %v1144_v62, %v1143_v61  ;;  %v2020_v5 = vpack.c.bf16 %v1146_v4, %v1145_v3  ;;  %p2299_p3 = pnand %p2298_p5, %p2292_p8 }
  0xa8   : > { %591 = vmatprep.mubr.f32.mxu0 %v2387_v0  ;;  %v2014_v1 = vpack.c.bf16 %v363_v60, %v362_v59  ;;  %v2024_v8 = vpack.c.bf16 %v1148_v7, %v1147_v6  ;;  %v2028_v11 = vpack.c.bf16 %v1150_v10, %v1149_v9  ;;  %v2036_v16 = vpack.c.bf16 %v1154_v15, %v1153_v14 }
  0xa9   : > { %1799 = vmatmul.mubr.msk.f32.gmra.mrb[2].mxu1 %vm366_vm0, %v2742_v34  ;;  %v2040_v19 = vpack.c.bf16 %v1156_v18, %v1155_v17  ;;  %v2044_v22 = vpack.c.bf16 %v1158_v21, %v1157_v20 }
  0xaa   : > { %668 = vmatprep.mubr.f32.mxu1 %v2387_v0 }
  0xab   : > { %1800 = vmatmul.mubr.msk.f32.vlgmr.msra.gmra.mrb[4].mxu0 %vm366_vm0, %v2726_v26 }
  0xac   : > { %1995 = vmatpush1.bf16.msra.mxu0 %v1994_v41  ;;  %597 = vmatprep.mubr.f32.mxu0 %v2387_v0 }
  0xad   : > { %1802 = vmatmul.mubr.msk.f32.vlgmr.msra.gmra.mrb[4].mxu1 %vm366_vm0, %v2726_v26  ;;  %2001 = vmatprep.subr.bf16.mxu0 %v2000_v43 }
  0xae   : > { %1999 = vmatpush1.bf16.msra.mxu1 %v1998_v42  ;;  %674 = vmatprep.mubr.f32.mxu1 %v2387_v0 }
  0xaf   : > { %1801 = vmatmul.mubr.msk.f32.gmra.mrb[6].mxu0 %vm366_vm0, %v2742_v34  ;;  %2005 = vmatprep.subr.bf16.mxu1 %v2004_v44 }
  0xb0   : > { %745 = vmatprep.mubr.f32.mxu0 %v2387_v0 }
  0xb1   : > { %1803 = vmatmul.mubr.msk.f32.gmra.mrb[6].mxu1 %vm366_vm0, %v2742_v34 }
  0xb2   : > { %822 = vmatprep.mubr.f32.mxu1 %v2387_v0 }
  0xb3   : > { %1804 = vmatmul.mubr.msk.f32.vlgmr.msra.gmra.mrb[8].mxu0 %vm366_vm0, %v2726_v26 }
  0xb4   : > { %2003 = vmatpush1.bf16.msra.mxu0 %v2002_v53  ;;  %751 = vmatprep.mubr.f32.mxu0 %v2387_v0 }
  0xb5   : > { %1806 = vmatmul.mubr.msk.f32.vlgmr.msra.gmra.mrb[8].mxu1 %vm366_vm0, %v2726_v26  ;;  %2009 = vmatprep.subr.bf16.mxu0 %v2008_v55 }
  0xb6   : > { %828 = vmatprep.mubr.f32.mxu1 %v2387_v0  ;;  %2007 = vmatpush1.bf16.msra.mxu1 %v2006_v54 }
  0xb7   : > { %1805 = vmatmul.mubr.msk.f32.gmra.mrb[10].mxu0 %vm366_vm0, %v2742_v34  ;;  %2013 = vmatprep.subr.bf16.mxu1 %v2012_v56 }
  0xb8   : > { %899 = vmatprep.mubr.f32.mxu0 %v2387_v0 }
  0xb9   : > { %1807 = vmatmul.mubr.msk.f32.gmra.mrb[10].mxu1 %vm366_vm0, %v2742_v34 }
  0xba   : > { %976 = vmatprep.mubr.f32.mxu1 %v2387_v0 }
  0xbb   : > { %1808 = vmatmul.mubr.msk.f32.vlgmr.msra.gmra.mrb[12].mxu0 %vm366_vm0, %v2726_v26 }
  0xbc   : > { %905 = vmatprep.mubr.f32.mxu0 %v2387_v0  ;;  %2011 = vmatpush1.bf16.msra.mxu0 %v2010_v63 }
  0xbd   : > { %1810 = vmatmul.mubr.msk.f32.vlgmr.msra.gmra.mrb[12].mxu1 %vm366_vm0, %v2726_v26  ;;  %2017 = vmatprep.subr.bf16.mxu0 %v2016_v2 }
  0xbe   : > { %982 = vmatprep.mubr.f32.mxu1 %v2387_v0  ;;  %2015 = vmatpush1.bf16.msra.mxu1 %v2014_v1 }
  0xbf   : > { %1809 = vmatmul.mubr.msk.f32.gmra.mrb[14].mxu0 %vm366_vm0, %v2742_v34  ;;  %2048 = vmatprep.subr.bf16.mxu1 %v2016_v2 }
  0xc0   : > { %1053 = vmatprep.mubr.f32.mxu0 %v2387_v0 }
  0xc1   : > { %1811 = vmatmul.mubr.msk.f32.gmra.mrb[14].mxu1 %vm366_vm0, %v2742_v34 }
  0xc2   : > { %1130 = vmatprep.mubr.f32.mxu1 %v2387_v0 }
  0xc3   : > { %1812 = vmatmul.mubr.msk.f32.vlgmr.msra.gmra.mrb[16].mxu0 %vm366_vm0, %v2726_v26 }
  0xc4   : > { %1059 = vmatprep.mubr.f32.mxu0 %v2387_v0  ;;  %2019 = vmatpush3.bf16.msra.mxu0 %v2016_v2 }
  0xc5   : > { %1814 = vmatmul.mubr.msk.f32.vlgmr.msra.gmra.mrb[16].mxu1 %vm366_vm0, %v2726_v26  ;;  %2021 = vmatprep.subr.bf16.mxu0 %v2020_v5 }
  0xc6   : > { %1136 = vmatprep.mubr.f32.mxu1 %v2387_v0  ;;  %2056 = vmatpush3.bf16.msra.mxu1 %v2016_v2  ;;  %v2032_v0 = vpack.c.bf16 %v1152_v13, %v1151_v12 }
  0xc7   : > { %1813 = vmatmul.mubr.msk.f32.gmra.mrb[18].mxu0 %vm366_vm0, %v2742_v34  ;;  %2049 = vmatprep.subr.bf16.mxu1 %v2020_v5 }
  0xc8   : > { %2023 = vmatpush3.bf16.msra.mxu0 %v2020_v5 }
  0xc9   : > { %1815 = vmatmul.mubr.msk.f32.gmra.mrb[18].mxu1 %vm366_vm0, %v2742_v34  ;;  %2025 = vmatprep.subr.bf16.mxu0 %v2024_v8 }
  0xca   : > { %2057 = vmatpush3.bf16.msra.mxu1 %v2020_v5 }
  0xcb   : > { %2050 = vmatprep.subr.bf16.mxu1 %v2024_v8 }
  0xcc   : > { %2027 = vmatpush3.bf16.msra.mxu0 %v2024_v8 }
  0xcd   : > { %2029 = vmatprep.subr.bf16.mxu0 %v2028_v11 }
  0xce   : > { %2058 = vmatpush3.bf16.msra.mxu1 %v2024_v8 }
  0xcf   : > { %2051 = vmatprep.subr.bf16.mxu1 %v2028_v11 }
  0xd0   : > { %2031 = vmatpush3.bf16.msra.mxu0 %v2028_v11 }
  0xd1   : > { %2033 = vmatprep.subr.bf16.mxu0 %v2032_v0 }
  0xd2   : > { %2059 = vmatpush3.bf16.msra.mxu1 %v2028_v11 }
  0xd3   : > { %2052 = vmatprep.subr.bf16.mxu1 %v2032_v0 }
  0xd4   : > { %2035 = vmatpush3.bf16.msra.mxu0 %v2032_v0 }
  0xd5   : > { %2037 = vmatprep.subr.bf16.mxu0 %v2036_v16 }
  0xd6   : > { %2060 = vmatpush3.bf16.msra.mxu1 %v2032_v0 }
  0xd7   : > { %2053 = vmatprep.subr.bf16.mxu1 %v2036_v16 }
  0xd8   : > { %2039 = vmatpush3.bf16.msra.mxu0 %v2036_v16 }
  0xd9   : > { %2041 = vmatprep.subr.bf16.mxu0 %v2040_v19 }
  0xda   : > { %2061 = vmatpush3.bf16.msra.mxu1 %v2036_v16 }
  0xdb   : > { %2054 = vmatprep.subr.bf16.mxu1 %v2040_v19 }
  0xdc   : > { %2043 = vmatpush3.bf16.msra.mxu0 %v2040_v19 }
  0xdd   : > { %2045 = vmatprep.subr.bf16.mxu0 %v2044_v22 }
  0xde   : > { %2062 = vmatpush3.bf16.msra.mxu1 %v2040_v19 }
  0xdf   : > { %2055 = vmatprep.subr.bf16.mxu1 %v2044_v22 }
  0xe0   : > { %2047 = vmatpush3.bf16.msra.mxu0 %v2044_v22 }
  0xe2   : > { %2063 = vmatpush3.bf16.msra.mxu1 %v2044_v22 }
 0x175   : > { %v439_v23 = vpop.f32.mrb[0].mxu0 }
 0x176   : > { %v441_v25 = vpop.f32.mrb[1].mxu0  ;;  %1916 = vmatprep.mubr.f32.mxu0 %v439_v23 }
 0x178   : > { %v516_v24 = vpop.f32.mrb[0].mxu1 }
 0x179   : > { %v518_v26 = vpop.f32.mrb[1].mxu1 }
 0x17a   : > { %v445_v27 = vpop.f32.mrb[2].mxu0 }
 0x17b   : > { %v447_v29 = vpop.f32.mrb[3].mxu0  ;;  %1917 = vmatmul.mubr.f32.vlgmr.msra.gmra.mrb[20].mxu0 %v445_v27 }
 0x17c   : > { %v522_v28 = vpop.f32.mrb[2].mxu1  ;;  %1919 = vmatprep.mubr.f32.mxu0 %v441_v25 }
 0x17d   : > { %v524_v30 = vpop.f32.mrb[3].mxu1 }
 0x17e   : > { %v593_v31 = vpop.f32.mrb[4].mxu0 }
 0x17f   : > { %v595_v33 = vpop.f32.mrb[5].mxu0  ;;  %1920 = vmatmul.mubr.f32.gmra.mrb[22].mxu0 %v447_v29 }
 0x180   : > { %v670_v32 = vpop.f32.mrb[4].mxu1  ;;  %1922 = vmatprep.mubr.f32.mxu0 %v516_v24 }
 0x181   : > { %v672_v34 = vpop.f32.mrb[5].mxu1 }
 0x182   : > { %v599_v35 = vpop.f32.mrb[6].mxu0 }
 0x183   : > { %v601_v37 = vpop.f32.mrb[7].mxu0  ;;  %1923 = vmatmul.mubr.f32.gmra.mrb[24].mxu0 %v522_v28 }
 0x184   : > { %v676_v36 = vpop.f32.mrb[6].mxu1  ;;  %1925 = vmatprep.mubr.f32.mxu0 %v518_v26 }
 0x185   : > { %v678_v38 = vpop.f32.mrb[7].mxu1 }
 0x186   : > { %v747_v39 = vpop.f32.mrb[8].mxu0 }
 0x187   : > { %v749_v41 = vpop.f32.mrb[9].mxu0  ;;  %1926 = vmatmul.mubr.f32.gmra.mrb[26].mxu0 %v524_v30 }
 0x188   : > { %v824_v40 = vpop.f32.mrb[8].mxu1  ;;  %1928 = vmatprep.mubr.f32.mxu0 %v593_v31 }
 0x189   : > { %v826_v42 = vpop.f32.mrb[9].mxu1  ;;  %1946 = vmatprep.mubr.f32.mxu1 %v824_v40 }
 0x18a   : > { %v753_v43 = vpop.f32.mrb[10].mxu0 }
 0x18b   : > { %v755_v45 = vpop.f32.mrb[11].mxu0  ;;  %1929 = vmatmul.mubr.f32.gmra.mrb[28].mxu0 %v599_v35 }
 0x18c   : > { %v830_v44 = vpop.f32.mrb[10].mxu1  ;;  %1931 = vmatprep.mubr.f32.mxu0 %v595_v33 }
 0x18d   : > { %v832_v46 = vpop.f32.mrb[11].mxu1  ;;  %1947 = vmatmul.mubr.f32.vlgmr.msra.gmra.mrb[20].mxu1 %v830_v44 }
 0x18e   : > { %1949 = vmatprep.mubr.f32.mxu1 %v826_v42  ;;  %v901_v47 = vpop.f32.mrb[12].mxu0 }
 0x18f   : > { %v903_v48 = vpop.f32.mrb[13].mxu0  ;;  %1932 = vmatmul.mubr.f32.gmra.mrb[30].mxu0 %v601_v37 }
 0x190   : > { %v978_v49 = vpop.f32.mrb[12].mxu1  ;;  %1934 = vmatprep.mubr.f32.mxu0 %v670_v32 }
 0x191   : > { %1950 = vmatmul.mubr.f32.gmra.mrb[22].mxu1 %v832_v46  ;;  %v980_v50 = vpop.f32.mrb[13].mxu1 }
 0x192   : > { %1952 = vmatprep.mubr.f32.mxu1 %v901_v47  ;;  %v907_v51 = vpop.f32.mrb[14].mxu0 }
 0x193   : > { %v909_v52 = vpop.f32.mrb[15].mxu0  ;;  %1935 = vmatmul.mubr.f32.gmra.mrb[32].mxu0 %v676_v36 }
 0x194   : > { %v984_v53 = vpop.f32.mrb[14].mxu1  ;;  %1937 = vmatprep.mubr.f32.mxu0 %v672_v34 }
 0x195   : > { %1953 = vmatmul.mubr.f32.gmra.mrb[24].mxu1 %v907_v51  ;;  %v986_v54 = vpop.f32.mrb[15].mxu1 }
 0x196   : > { %1955 = vmatprep.mubr.f32.mxu1 %v903_v48  ;;  %v1055_v55 = vpop.f32.mrb[16].mxu0 }
 0x197   : > { %1938 = vmatmul.mubr.f32.gmra.mrb[34].mxu0 %v678_v38  ;;  %v1057_v56 = vpop.f32.mrb[17].mxu0 }
 0x198   : > { %v1132_v57 = vpop.f32.mrb[16].mxu1  ;;  %1940 = vmatprep.mubr.f32.mxu0 %v747_v39 }
 0x199   : > { %1956 = vmatmul.mubr.f32.gmra.mrb[26].mxu1 %v909_v52  ;;  %v1134_v58 = vpop.f32.mrb[17].mxu1 }
 0x19a   : > { %1958 = vmatprep.mubr.f32.mxu1 %v978_v49  ;;  %v1061_v59 = vpop.f32.mrb[18].mxu0 }
 0x19b   : > { %1941 = vmatmul.mubr.f32.gmra.mrb[36].mxu0 %v753_v43  ;;  %v1063_v60 = vpop.f32.mrb[19].mxu0 }
 0x19c   : > { %v1138_v61 = vpop.f32.mrb[18].mxu1  ;;  %1943 = vmatprep.mubr.f32.mxu0 %v749_v41 }
 0x19d   : > { %1959 = vmatmul.mubr.f32.gmra.mrb[28].mxu1 %v984_v53  ;;  %v1140_v62 = vpop.f32.mrb[19].mxu1 }
 0x19e   : > { %1961 = vmatprep.mubr.f32.mxu1 %v980_v50 }
 0x19f   : > { %1944 = vmatmul.mubr.f32.gmra.mrb[38].mxu0 %v755_v45 }
 0x1a1   : > { %1962 = vmatmul.mubr.f32.gmra.mrb[30].mxu1 %v986_v54 }
 0x1a2   : > { %1964 = vmatprep.mubr.f32.mxu1 %v1055_v55 }
 0x1a5   : > { %1965 = vmatmul.mubr.f32.gmra.mrb[32].mxu1 %v1061_v59 }
 0x1a6   : > { %1967 = vmatprep.mubr.f32.mxu1 %v1057_v56 }
 0x1a9   : > { %1968 = vmatmul.mubr.f32.gmra.mrb[34].mxu1 %v1063_v60 }
 0x1aa   : > { %1970 = vmatprep.mubr.f32.mxu1 %v1132_v57 }
 0x1ad   : > { %1971 = vmatmul.mubr.f32.gmra.mrb[36].mxu1 %v1138_v61 }
 0x1ae   : > { %1973 = vmatprep.mubr.f32.mxu1 %v1134_v58 }
 0x1b1   : > { %1974 = vmatmul.mubr.f32.gmra.mrb[38].mxu1 %v1140_v62 }
 0x24e   : > { %v1918_v63 = vpop.f32.mrb[20].mxu0 }
 0x24f   : > { %v1225_v1 = vpop.f32.mrb[21].mxu0  ;;  %v1473_v8 = vmul.f32 2.0, %v1918_v63  ;;  %v2840_v12 = vmul.f32 %v1918_v63, %v1918_v63 }
 0x250   : > { %v1472_v9 = vmul.f32 2.0, %v1225_v1  ;;  %v2842_v13 = vmul.f32 %v1225_v1, %v1225_v1 }
 0x252   : > { %v1921_v2 = vpop.f32.mrb[22].mxu0 }
 0x253   : > { %v1235_v3 = vpop.f32.mrb[23].mxu0  ;;  %v1475_v24 = vmul.f32 2.0, %v1921_v2  ;;  %v2874_v31 = vmul.f32 %v1921_v2, %v1921_v2 }
 0x254   : > { %v1474_v27 = vmul.f32 2.0, %v1235_v3  ;;  %v2896_v42 = vmul.f32 %v1235_v3, %v1235_v3 }
 0x256   : > { %v1924_v4 = vpop.f32.mrb[24].mxu0 }
 0x257   : > { %v1245_v5 = vpop.f32.mrb[25].mxu0  ;;  %v2838_v11 = vmul.f32 %v1924_v4, %v1924_v4  ;;  %v1477_v43 = vmul.f32 2.0, %v1924_v4 }
 0x258   : > { %v2848_v16 = vmul.f32 %v1245_v5, %v1245_v5  ;;  %v1476_v47 = vmul.f32 2.0, %v1245_v5 }
 0x25a   : > { %v2834_v6 = vpop.f32.mrb[26].mxu0 }
 0x25b   : > { %v2836_v7 = vpop.f32.mrb[27].mxu0  ;;  %v2870_v29 = vmul.f32 %v2834_v6, %v2834_v6  ;;  %v1479_v59 = vmul.f32 2.0, %v2834_v6 }
 0x25c   : > { %v2882_v35 = vmul.f32 %v2836_v7, %v2836_v7 }
 0x25e   : > { %v1930_v10 = vpop.f32.mrb[28].mxu0 }
 0x25f   : > { %v2844_v0 = vmul.f32 %v1930_v10, %v1473_v8  ;;  %v1265_v15 = vpop.f32.mrb[29].mxu0  ;;  %v2850_v17 = vmul.f32 %v1930_v10, %v1930_v10  ;;  %v2852_v18 = vmul.f32 %v1930_v10, %v1918_v63  ;;  %v1478_v63 = vmul.f32 2.0, %v2836_v7 }
 0x260   : > { %v2846_v14 = vpop.f32.mrb[20].mxu1  ;;  %v2856_v20 = vmul.f32 %v1472_v9, %v1265_v15  ;;  %v2860_v22 = vmul.f32 %v1265_v15, %v1265_v15  ;;  %v2862_v23 = vmul.f32 %v1265_v15, %v1225_v1 }
 0x261   : > { %v1437_v19 = vsub.f32 %v2846_v14, %v2838_v11  ;;  %v2858_v21 = vpop.f32.mrb[21].mxu1  ;;  %v1521_v26 = vadd.f32 %v2850_v17, %v2840_v12 }
 0x262   : > { %v1436_v25 = vsub.f32 %v2858_v21, %v2848_v16  ;;  %v1933_v28 = vpop.f32.mrb[30].mxu0  ;;  %v1520_v30 = vadd.f32 %v2860_v22, %v2842_v13 }
 0x263   : > { %v2876_v32 = vmul.f32 %v1933_v28, %v1475_v24  ;;  %v1275_v34 = vpop.f32.mrb[31].mxu0  ;;  %v2884_v36 = vmul.f32 %v1933_v28, %v1933_v28  ;;  %v2886_v37 = vmul.f32 %v1933_v28, %v1921_v2 }
 0x264   : > { %v2878_v33 = vpop.f32.mrb[22].mxu1  ;;  %v2890_v39 = vmul.f32 %v1474_v27, %v1275_v34  ;;  %v2894_v41 = vmul.f32 %v1275_v34, %v1275_v34  ;;  %v2902_v46 = vmul.f32 %v1275_v34, %v1235_v3 }
 0x265   : > { %v1439_v38 = vsub.f32 %v2878_v33, %v2870_v29  ;;  %v2892_v40 = vpop.f32.mrb[23].mxu1  ;;  %v1523_v45 = vadd.f32 %v2884_v36, %v2874_v31 }
 0x266   : > { %v1936_v48 = vpop.f32.mrb[32].mxu0  ;;  %v1522_v49 = vadd.f32 %v2894_v41, %v2896_v42 }
 0x267   : > { %v2906_v50 = vmul.f32 %v1936_v48, %v1477_v43  ;;  %v1285_v52 = vpop.f32.mrb[33].mxu0  ;;  %v1445_v53 = vmul.f32 %v1936_v48, %v1936_v48  ;;  %v2908_v54 = vmul.f32 %v1936_v48, %v1924_v4 }
 0x268   : > { %v1954_v51 = vpop.f32.mrb[24].mxu1  ;;  %v2911_v56 = vmul.f32 %v1476_v47, %v1285_v52  ;;  %v1444_v58 = vmul.f32 %v1285_v52, %v1285_v52  ;;  %v2916_v62 = vmul.f32 %v1285_v52, %v1245_v5 }
 0x269   : > { %v1449_v55 = vsub.f32 %v1954_v51, %v2850_v17  ;;  %v1345_v57 = vpop.f32.mrb[25].mxu1  ;;  %v1525_v61 = vadd.f32 %v1445_v53, %v2838_v11 }
 0x26a   : > { %v1448_v60 = vsub.f32 %v1345_v57, %v2860_v22  ;;  %v1939_v1 = vpop.f32.mrb[34].mxu0  ;;  %v1524_v2 = vadd.f32 %v1444_v58, %v2848_v16  ;;  %v1528_v57 = vadd.f32 0.0001, %v1520_v30 }
 0x26b   : > { %v2920_v3 = vmul.f32 %v1939_v1, %v1479_v59  ;;  %v1295_v8 = vpop.f32.mrb[35].mxu0  ;;  %v1447_v9 = vmul.f32 %v1939_v1, %v1939_v1  ;;  %v2923_v10 = vmul.f32 %v1939_v1, %v2834_v6  ;;  %v1529_v6 = vadd.f32 0.0001, %v1521_v26 }
 0x26c   : > { %v1957_v4 = vpop.f32.mrb[26].mxu1  ;;  %v2926_v17 = vmul.f32 %v1478_v63, %v1295_v8  ;;  %v1446_v5 = vmul.f32 %v1295_v8, %v1295_v8  ;;  %v2931_v28 = vmul.f32 %v1295_v8, %v2836_v7  ;;  %v1531_v63 = vadd.f32 0.0001, %v1523_v45 }
 0x26d   : > { %v1451_v15 = vsub.f32 %v1957_v4, %v2884_v36  ;;  %v1355_v22 = vpop.f32.mrb[27].mxu1  ;;  %v1527_v27 = vadd.f32 %v1447_v9, %v2870_v29  ;;  %v1533_v1 = vadd.f32 0.0001, %v1525_v61  ;;  %v1532_v44 = vadd.f32 0.0001, %v1524_v2 }
 0x26e   : > { %v1450_v24 = vsub.f32 %v1355_v22, %v2894_v41  ;;  %v1942_v34 = vpop.f32.mrb[36].mxu0  ;;  %v1526_v43 = vadd.f32 %v1446_v5, %v2882_v35  ;;  %v1530_v22 = vadd.f32 0.0001, %v1522_v49 }
 0x26f   : > { %v1433_v47 = vsub.f32 %v1942_v34, %v2840_v12  ;;  %v1305_v51 = vpop.f32.mrb[37].mxu0  ;;  %v1535_v26 = vadd.f32 0.0001, %v1527_v27 }
 0x270   : > { %v1960_v48 = vpop.f32.mrb[28].mxu1  ;;  %v1432_v52 = vsub.f32 %v1305_v51, %v2842_v13 }
 0x271   : > { %v1453_v36 = vsub.f32 %v1960_v48, %v1445_v53  ;;  %v1365_v59 = vpop.f32.mrb[29].mxu1  ;;  %v1537_v41 = vadd.f32 %v1449_v55, %v1433_v47  ;;  %v1534_v55 = vadd.f32 0.0001, %v1526_v43 }
 0x272   : > { %v1452_v4 = vsub.f32 %v1365_v59, %v1444_v58  ;;  %v1536_v8 = vadd.f32 %v1448_v60, %v1432_v52  ;;  %v1945_v12 = vpop.f32.mrb[38].mxu0 }
 0x273   : > { %v1541_v7 = vadd.f32 %v1453_v36, %v1437_v19  ;;  %v1545_v34 = vadd.f32 0.0009, %v1537_v41  ;;  %v1435_v30 = vsub.f32 %v1945_v12, %v2874_v31  ;;  %v1315_v53 = vpop.f32.mrb[39].mxu0 }
 0x274   : > { %v1540_v13 = vadd.f32 %v1452_v4, %v1436_v25  ;;  %v1963_v45 = vpop.f32.mrb[30].mxu1  ;;  %v1544_v49 = vadd.f32 0.0009, %v1536_v8  ;;  %v1434_v11 = vsub.f32 %v1315_v53, %v2896_v42 }
 0x275   : > { %v1549_v58 = vadd.f32 0.0009, %v1541_v7  ;;  %v1455_v61 = vsub.f32 %v1963_v45, %v1447_v9  ;;  %v1375_v14 = vpop.f32.mrb[31].mxu1  ;;  %v1553_v19 = vmul.f32 %v1545_v34, %v1529_v6  ;;  %v1539_v2 = vadd.f32 %v1451_v15, %v1435_v30 }
 0x276   : > { %v1548_v60 = vadd.f32 0.0009, %v1540_v13  ;;  %v1454_v27 = vsub.f32 %v1375_v14, %v1446_v5  ;;  %v1552_v48 = vmul.f32 %v1544_v49, %v1528_v57  ;;  %v1538_v21 = vadd.f32 %v1450_v24, %v1434_v11 }
 0x277   : > { %v1557_v47 = vmul.f32 %v1549_v58, %v1533_v1  ;;  %v1543_v16 = vadd.f32 %v1455_v61, %v1439_v38  ;;  %2157 = vrcp.f32 %v1553_v19  ;;  %v1547_v31 = vadd.f32 0.0009, %v1539_v2 }
 0x278   : > { %v1556_v25 = vmul.f32 %v1548_v60, %v1532_v44  ;;  %v3083_v9 = vsub.f32 %v2892_v40, %v2882_v35  ;;  %v1966_v42 = vpop.f32.mrb[32].mxu1  ;;  %v1546_v6 = vadd.f32 0.0009, %v1538_v21  ;;  %2159 = vrcp.f32 %v1552_v48 }
 0x279   : > { %v1551_v51 = vadd.f32 0.0009, %v1543_v16  ;;  %v1465_v15 = vsub.f32 %v1966_v42, %v2852_v18  ;;  %v1385_v5 = vpop.f32.mrb[33].mxu1  ;;  %v1555_v36 = vmul.f32 %v1547_v31, %v1531_v63  ;;  %v1489_v35 = vadd.f32 0.0001, %v2844_v0 }
 0x27a   : > { %v1542_v43 = vadd.f32 %v1454_v27, %v3083_v9  ;;  %v1464_v29 = vsub.f32 %v1385_v5, %v2862_v23  ;;  %v1554_v38 = vmul.f32 %v1546_v6, %v1530_v22  ;;  %v1488_v1 = vadd.f32 0.0001, %v2856_v20 }
 0x27b   : > { %v1559_v33 = vmul.f32 %v1551_v51, %v1535_v26  ;;  %v1497_v24 = vmul.f32 2.0, %v1465_v15  ;;  %2161 = vrcp.f32 %v1555_v36  ;;  %v1491_v26 = vadd.f32 0.0001, %v2876_v32 }
 0x27c   : > { %v1550_v52 = vadd.f32 0.0009, %v1542_v43  ;;  %v1496_v57 = vmul.f32 2.0, %v1464_v29  ;;  %v1969_v59 = vpop.f32.mrb[34].mxu1  ;;  %2163 = vrcp.f32 %v1557_v47  ;;  %v1490_v30 = vadd.f32 0.0001, %v2890_v39 }
 0x27d   : > { %v1505_v40 = vadd.f32 0.0009, %v1497_v24  ;;  %v1467_v41 = vsub.f32 %v1969_v59, %v2886_v37  ;;  %v1395_v18 = vpop.f32.mrb[35].mxu1  ;;  %2165 = vrcp.f32 %v1554_v38  ;;  %v1493_v49 = vadd.f32 0.0001, %v2906_v50 }
 0x27e   : > { %v1558_v44 = vmul.f32 %v1550_v52, %v1534_v55  ;;  %v1504_v63 = vadd.f32 0.0009, %v1496_v57  ;;  %v1466_v23 = vsub.f32 %v1395_v18, %v2902_v46  ;;  %2167 = vrcp.f32 %v1556_v25 }
 0x27f   : > { %v1513_v4 = vmul.f32 %v1505_v40, %v1489_v35  ;;  %v1499_v22 = vmul.f32 2.0, %v1467_v41  ;;  %2169 = vrcp.f32 %v1559_v33  ;;  %v1492_v27 = vadd.f32 0.0001, %v2911_v56 }
 0x280   : > { %v1512_v7 = vmul.f32 %v1504_v63, %v1488_v1  ;;  %v1498_v8 = vmul.f32 2.0, %v1466_v23  ;;  %v1972_v12 = vpop.f32.mrb[36].mxu1  ;;  %2171 = vrcp.f32 %v1558_v44  ;;  %v1494_v43 = vadd.f32 0.0001, %v2926_v17 }
 0x281   : > { %v1507_v0 = vadd.f32 0.0009, %v1499_v22  ;;  %v1469_v34 = vsub.f32 %v1972_v12, %v2908_v54  ;;  %v1405_v13 = vpop.f32.mrb[37].mxu1  ;;  %v2158_v37 = vpop.eup %2157 }
 0x282   : > { %v1506_v20 = vadd.f32 0.0009, %v1498_v8  ;;  %v1468_v45 = vsub.f32 %v1405_v13, %v2916_v62  ;;  %v1569_v46 = vmul.f32 %v2158_v37, %v1513_v4  ;;  %v2160_v58 = vpop.eup %2159  ;;  %v1495_v62 = vadd.f32 0.0001, %v2920_v3 }
 0x283   : > { %v1515_v53 = vmul.f32 %v1507_v0, %v1491_v26  ;;  %v1501_v55 = vmul.f32 2.0, %v1469_v34  ;;  %v1568_v54 = vmul.f32 %v2160_v58, %v1512_v7 }
 0x284   : > { %v1514_v61 = vmul.f32 %v1506_v20, %v1490_v30  ;;  %v1500_v32 = vmul.f32 2.0, %v1468_v45  ;;  %v1975_v11 = vpop.f32.mrb[38].mxu1  ;;  %v1577_v14 = vsub.f32 1.0, %v1569_v46 }
 0x285   : > { %v1509_v19 = vadd.f32 0.0009, %v1501_v55  ;;  %v1471_v60 = vsub.f32 %v1975_v11, %v2923_v10  ;;  %v1415_v39 = vpop.f32.mrb[39].mxu1  ;;  %v2162_v2 = vpop.eup %2161  ;;  %v1576_v50 = vsub.f32 1.0, %v1568_v54 }
 0x286   : > { %v1508_v47 = vadd.f32 0.0009, %v1500_v32  ;;  %v1470_v48 = vsub.f32 %v1415_v39, %v2931_v28  ;;  %v2164_v16 = vpop.eup %2163  ;;  %v1585_v21 = vmul.f32 0.5, %v1577_v14  ;;  %v1571_v25 = vmul.f32 %v2162_v2, %v1515_v53 }
 0x287   : > { %v1517_v31 = vmul.f32 %v1509_v19, %v1493_v49  ;;  %v2166_v9 = vpop.eup %2165  ;;  %v1503_v51 = vmul.f32 2.0, %v1471_v60  ;;  %v1584_v5 = vmul.f32 0.5, %v1576_v50 }
 0x288   : > { %v1516_v42 = vmul.f32 %v1508_v47, %v1492_v27  ;;  %v1502_v10 = vmul.f32 2.0, %v1470_v48  ;;  %v2168_v6 = vpop.eup %2167  ;;  %v1593_v15 = vmax.f32 %v1585_v21, 0.0  ;;  %v1579_v56 = vsub.f32 1.0, %v1571_v25 }
 0x289   : > { %v1570_v3 = vmul.f32 %v2166_v9, %v1514_v61  ;;  %v1573_v36 = vmul.f32 %v2164_v16, %v1517_v31  ;;  %v1511_v28 = vadd.f32 0.0009, %v1503_v51  ;;  %v1592_v38 = vmax.f32 %v1584_v5, 0.0  ;;  %v2170_v57 = vpop.eup %2169 }
 0x28a   : > { %v1572_v52 = vmul.f32 %v2168_v6, %v1516_v42  ;;  %v1510_v29 = vadd.f32 0.0009, %v1502_v10  ;;  %v1601_v33 = vmin.f32 %v1593_v15, 1.0  ;;  %v1587_v24 = vmul.f32 0.5, %v1579_v56  ;;  %v2172_v41 = vpop.eup %2171 }
 0x28b   : > { %v1578_v44 = vsub.f32 1.0, %v1570_v3  ;;  %v1581_v59 = vsub.f32 1.0, %v1573_v36  ;;  %v1519_v35 = vmul.f32 %v1511_v28, %v1495_v62  ;;  %v1600_v18 = vmin.f32 %v1592_v38, 1.0 }
 0x28c   : > { %v1580_v17 = vsub.f32 1.0, %v1572_v52  ;;  %v1518_v40 = vmul.f32 %v1510_v29, %v1494_v43  ;;  %1609 = vst [vmem:[%s2967_s25 + $0x8] sm:$0xff] %v1601_v33  ;;  %v1595_v1 = vmax.f32 %v1587_v24, 0.0 }
 0x28d   : > { %v1586_v63 = vmul.f32 0.5, %v1578_v44  ;;  %v1589_v23 = vmul.f32 0.5, %v1581_v59  ;;  %v1575_v22 = vmul.f32 %v2170_v57, %v1519_v35  ;;  %1608 = vst [vmem:[%s2967_s25] sm:$0xff] %v1600_v18 }
 0x28e   : > { %v1588_v4 = vmul.f32 0.5, %v1580_v17  ;;  %v1574_v7 = vmul.f32 %v2172_v41, %v1518_v40  ;;  %v1603_v8 = vmin.f32 %v1595_v1, 1.0 }
 0x28f   : > { %v1594_v12 = vmax.f32 %v1586_v63, 0.0  ;;  %v1597_v26 = vmax.f32 %v1589_v23, 0.0  ;;  %v1583_v34 = vsub.f32 1.0, %v1575_v22 }
 0x290   : > { %v1596_v0 = vmax.f32 %v1588_v4, 0.0  ;;  %v1582_v13 = vsub.f32 1.0, %v1574_v7  ;;  %1611 = vst [vmem:[%s2967_s25 + $0x18] sm:$0xff] %v1603_v8 }
 0x291   : > { %v1602_v37 = vmin.f32 %v1594_v12, 1.0  ;;  %v1605_v30 = vmin.f32 %v1597_v26, 1.0  ;;  %v1591_v45 = vmul.f32 0.5, %v1583_v34 }
 0x292   : > { %v1604_v20 = vmin.f32 %v1596_v0, 1.0  ;;  %v1590_v46 = vmul.f32 0.5, %v1582_v13 }
 0x293   : > { %1610 = vst [vmem:[%s2967_s25 + $0x10] sm:$0xff] %v1602_v37  ;;  %1613 = vst [vmem:[%s2967_s25 + $0x28] sm:$0xff] %v1605_v30  ;;  %v1599_v53 = vmax.f32 %v1591_v45, 0.0 }
 0x294   : > { %1612 = vst [vmem:[%s2967_s25 + $0x20] sm:$0xff] %v1604_v20  ;;  %v1598_v55 = vmax.f32 %v1590_v46, 0.0 }
 0x295   : > { %v1607_v58 = vmin.f32 %v1599_v53, 1.0 }
 0x296   : > { %v1606_v49 = vmin.f32 %v1598_v55, 1.0 }
 0x297   : > { %1615 = vst [vmem:[%s2967_s25 + $0x38] sm:$0xff] %v1607_v58 }
 0x298   : > { %1614 = vst [vmem:[%s2967_s25 + $0x30] sm:$0xff] %v1606_v49 }
 0x299   : > { %2302 = shalt.err (!%p2299_p3)
}
 0x29a   : > { %s2303_s7 = scalar_lea.hbm %s2980_s0, 1024  ;;  %s2307_s14 = scalar_lea.hbm %s3084_s22, 2048 }
 0x29b   : > { %p2304_p10 = scmp.ne.s32.totalorder %s2980_s0, %s2303_s7  ;;  %p2308_p2 = scmp.lt.u32.totalorder %s2980_s0, %s3084_s22 }
 0x29c   : > { %p2309_p0 = scmp.lt.u32.totalorder %s2307_s14, %s2303_s7  ;;  %p2311_p6 = scmp.lt.u32.totalorder %s2303_s7, %s2980_s0 }
 0x29d   : > { %p2305_p7 = pnand %p2304_p10, %p3085_p13 }
 0x29e   : > { %p2310_p4 = por %p2309_p0, %p2308_p2 }
 0x29f   : > { %p2306_p9 = pneg %p2305_p7 }
 0x2a0   : > { %p2312_p11 = por %p2311_p6, %p2310_p4 }
 0x2a2   : > { %p2313_p8 = pnand %p2312_p11, %p2306_p9 }
 0x2a4   : > { %2316 = shalt.err (!%p2313_p8)
}
 0x2a5   : > { %s2389_s23 = smov 128   ;;  %s2390_s6 = smov 8  }
 0x2a6   : > { %2076 = dma.vmem_to_hbm [thread:$0]  (%p3085_p13), %s2982_s30, 1024, %s2980_s0, %s2988_s18, %s2389_s23, %s2389_s23, %s2390_s6  }
 0x2a7 PF: > { %s3086_s29 = sld [smem:[#allocation14_spill]]  ;;  %s3087_s28 = sld [smem:[#allocation16_spill]] }
 0x2a8   : > { %p3089_p1 = scmp.ge.s32.totalorder %s2379_s20, 2 }
 0x2ad   : > { %s1648_s9 = sand.u32 1, %s3086_s29   ;;  %p3088_p12 = scmp.ne.s32.totalorder %s3087_s28, 0 }
 0x2ae   : > { %s1649_s11 = scalar_lea.sflag [#allocation4], %s1648_s9 }
 0x2af   : > { %p2093_p5 = pnand %p3089_p1, %p3088_p12 }
 0x2b1   : > { %2354 = dma.done.wait (!%p2093_p5), %s1649_s11, 1024  }
 0x2b2   : > { %2356 = vsyncadd (!%p2093_p5), %s1649_s11, 4294966272  ;;  %s19_s20 = sadd.s32 1, %s2379_s20   ;;  %s3090_s21 = sld [smem:[#allocation15_spill]] }
 0x2b3   : > { %p16_p3 = scmp.ge.s32.totalorder %s19_s20, 4   ;;  %s3091_s17 = sld [smem:[#allocation18_spill]] }
 0x2b4   : > { %s3092_s26 = sld [smem:[#allocation17_spill]]  ;;  %s3093_s15 = smov %s2363_s16 }
 0x2b5   : > { %s3095_s18 = smov %s2375_s19  ;;  %18 = sbr.rel (!%p16_p3) target bundleno = 10 (0xa), region = 106 }
 0x2b8   : > { %s3094_s16 = smov %s3090_s21 }
 0x2ba   : > { %s3096_s19 = smov %s3092_s26 }
 0x2bc   :  { %1654 = vsyncpa [#allocation3], 1 }
 0x2bd   :  { %1656 = vsyncpa [#allocation3 + $0x1], 1 }
 0x2be   :  { %1657 = vsyncpa [#allocation6], 1 }
 0x2bf   :  { %1658 = vsyncpa [#allocation4], 1 }
 0x2c0   :  { %1660 = vsyncpa [#allocation4 + $0x1], 1 }

</bundles_post_ra>
